<compile_context>
chip_gen: v5e
topology: v5e:2x2
jax: 0.10.0
libtpu: 0.0.40
codegen_flags: <defaults>
</compile_context>

<pallas_src>
import jax
import jax.numpy as jnp
from jax.experimental import pallas as pl
from jax.experimental.pallas import tpu as pltpu

# ----------------------------- config (small) -------------------------------
BATCH = 2
IN_CH = 3
IMG = 16
PATCH = 8
GRID = IMG // PATCH            # 2
N_PATCHES = GRID * GRID        # 4
SEQ = N_PATCHES + 1            # 5 (with CLS)
SEQ_PAD = 8                    # padded to sublane multiple
WIDTH = 32                     # transformer hidden size
HEADS = 2
DH = WIDTH // HEADS            # 16
LAYERS = 2
MLP_DIM = 4 * WIDTH            # 128
EMBED_DIM = 16                 # output embedding dim (proj)
LN_EPS = 1e-5

# ------------------- f32 parameter slab layout (one DMA) --------------------
ROW_LN_PRE_G = 0
ROW_LN_PRE_B = 1
ROW_LN_POST_G = 2
ROW_LN_POST_B = 3
ROW_SEQ = 4                                  # rows 4..11: (CLS+pos) init block
ROW_LAYER0 = ROW_SEQ + SEQ_PAD               # 12
ROWS_PER_LAYER = 8
# per-layer row offsets: 0 ln1_g, 1 ln1_b, 2 attn_out_b, 3 ln2_g, 4 ln2_b,
#                        5 fc2_b, 6 qkv_b (96 cols), 7 fc1_b (128 cols)
VEC_ROWS = ROW_LAYER0 + LAYERS * ROWS_PER_LAYER   # 28
VEC_ROWS_PAD = 32
VEC_COLS = 128


# --------------------------- fused forward kernel ---------------------------
def _fused_vit_kernel(
    patches_ref, vecs_ref, w_patch_ref,
    qkv_w_ref, attn_w_ref, fc1_w_ref, fc2_w_ref, proj_ref,
    o_ref,
):
    f32 = jnp.float32
    bf16 = jnp.bfloat16
    nb = patches_ref.shape[0] // SEQ_PAD      # batch size (static)

    def row(r, n=WIDTH):
        return vecs_ref[r:r + 1, 0:n]          # (1, n) f32 broadcast vector

    def ln(v, g, b):
        mean = jnp.mean(v, axis=-1, keepdims=True)
        var = jnp.mean((v - mean) ** 2, axis=-1, keepdims=True)
        return (v - mean) * jax.lax.rsqrt(var + LN_EPS) * g + b

    def mm(v, w):
        # bf16 MXU operands, f32 accumulation
        return jnp.dot(v.astype(bf16), w, preferred_element_type=f32)

    # ---- patch embed (conv1 as matmul) + CLS token + positional embedding ----
    # seq_init holds (cls + pos[0]) on the CLS row, pos[1:] on patch rows,
    # zeros on pad rows; patches has zero rows at CLS/pad positions.
    seq_init = vecs_ref[ROW_SEQ:ROW_SEQ + SEQ_PAD, 0:WIDTH]        # (8, W) f32
    x = jnp.tile(seq_init, (nb, 1)) + jnp.dot(
        patches_ref[...], w_patch_ref[...], preferred_element_type=f32)

    # ---- ln_pre ----
    x = ln(x, row(ROW_LN_PRE_G), row(ROW_LN_PRE_B))

    # additive key-padding bias: key columns >= SEQ get -1e30 before softmax
    col = jax.lax.broadcasted_iota(jnp.int32, (SEQ_PAD, SEQ_PAD), 1)
    key_bias = jnp.where(col < SEQ, 0.0, -1e30).astype(f32)        # (8, 8)

    for l in range(LAYERS):
        base = ROW_LAYER0 + l * ROWS_PER_LAYER

        # ------------------------- attention branch -------------------------
        h = ln(x, row(base + 0), row(base + 1))
        # 1/sqrt(DH) is pre-folded into the Q columns of qkv_w / qkv_b.
        qkv = mm(h, qkv_w_ref[l]) + row(base + 6, 3 * WIDTH)       # (B*8, 3W) f32
        qkv = qkv.astype(bf16)                                      # cast ONCE

        # gather per-(batch, head) q/k/v into (B*H, 8, DH) stacks (values only)
        qs, ks, vs = [], [], []
        for b in range(nb):
            blk = qkv[b * SEQ_PAD:(b + 1) * SEQ_PAD, :]
            for hh in range(HEADS):
                c = hh * DH
                qs.append(blk[:, c:c + DH])
                ks.append(blk[:, WIDTH + c:WIDTH + c + DH])
                vs.append(blk[:, 2 * WIDTH + c:2 * WIDTH + c + DH])
        q3 = jnp.stack(qs, axis=0)                                  # (B*H, 8, 16) bf16
        k3 = jnp.stack(ks, axis=0)
        v3 = jnp.stack(vs, axis=0)

        # batched QK^T + masked softmax (f32 stats) + PV
        s = jnp.einsum('bqd,bkd->bqk', q3, k3,
                       preferred_element_type=f32) + key_bias[None, :, :]
        m = jnp.max(s, axis=-1, keepdims=True)
        p = jnp.exp(s - m)
        p = p * pl.reciprocal(jnp.sum(p, axis=-1, keepdims=True), approx=True)
        o3 = jnp.einsum('bqk,bkd->bqd', p.astype(bf16), v3,
                        preferred_element_type=f32)                 # (B*H, 8, DH) f32

        # reassemble (heads -> lanes, batches -> sublanes), keep in registers
        attn_out = jnp.concatenate(
            [jnp.concatenate([o3[b * HEADS + hh] for hh in range(HEADS)], axis=-1)
             for b in range(nb)], axis=0)                           # (B*8, W) f32

        x = x + mm(attn_out, attn_w_ref[l]) + row(base + 2)

        # ---------------------------- MLP branch ----------------------------
        h = ln(x, row(base + 3), row(base + 4))
        h = mm(h, fc1_w_ref[l]) + row(base + 7, MLP_DIM)
        h = h * jax.nn.sigmoid(1.702 * h)           # QuickGELU, f32 on VPU/EUP
        x = x + mm(h, fc2_w_ref[l]) + row(base + 5)

    # ---- epilogue: ln_post on CLS rows, projection, F.normalize (batched) ----
    # (second F.normalize of the PyTorch module is idempotent and dropped)
    cls = jnp.concatenate(
        [x[b * SEQ_PAD:b * SEQ_PAD + 1, :] for b in range(nb)], axis=0)  # (B, W)
    cls = ln(cls, row(ROW_LN_POST_G), row(ROW_LN_POST_B))
    emb = mm(cls, proj_ref[...])                                    # (B, E) f32
    sq = jnp.sum(emb * emb, axis=-1, keepdims=True)
    # x / max(||x||, 1e-12)  ==  x * rsqrt(max(||x||^2, 1e-24))
    o_ref[...] = emb * jax.lax.rsqrt(jnp.maximum(sq, 1e-24))


# --------------------------- parameter construction -------------------------
def init_params(key):
    ks = iter(jax.random.split(key, 64))
    nrm = lambda shape, s=0.02: (s * jax.random.normal(next(ks), shape)).astype(jnp.float32)
    p = {
        "conv1_w": nrm((WIDTH, IN_CH, PATCH, PATCH)),          # NCHW conv weight, bias=False
        "cls": nrm((WIDTH,)),
        "pos": nrm((SEQ, WIDTH)),
        "ln_pre_g": jnp.ones((WIDTH,), jnp.float32),
        "ln_pre_b": jnp.zeros((WIDTH,), jnp.float32),
        "ln_post_g": jnp.ones((WIDTH,), jnp.float32),
        "ln_post_b": jnp.zeros((WIDTH,), jnp.float32),
        "proj": nrm((WIDTH, EMBED_DIM)),
        "layers": [],
    }
    for _ in range(LAYERS):
        p["layers"].append({
            "ln1_g": jnp.ones((WIDTH,), jnp.float32),
            "ln1_b": jnp.zeros((WIDTH,), jnp.float32),
            "qkv_w": nrm((WIDTH, 3 * WIDTH)),
            "qkv_b": jnp.zeros((3 * WIDTH,), jnp.float32),
            "attn_out_w": nrm((WIDTH, WIDTH)),
            "attn_out_b": jnp.zeros((WIDTH,), jnp.float32),
            "ln2_g": jnp.ones((WIDTH,), jnp.float32),
            "ln2_b": jnp.zeros((WIDTH,), jnp.float32),
            "fc1_w": nrm((WIDTH, MLP_DIM)),
            "fc1_b": jnp.zeros((MLP_DIM,), jnp.float32),
            "fc2_w": nrm((MLP_DIM, WIDTH)),
            "fc2_b": jnp.zeros((WIDTH,), jnp.float32),
        })
    return p


def pack_params(params):
    """One-time cast / reshape / stack into kernel-ready layouts (one f32 slab
    for all small vectors + bf16 weight stacks)."""
    f32, bf16 = jnp.float32, jnp.bfloat16
    cpp = IN_CH * PATCH * PATCH
    scale = 1.0 / (DH ** 0.5)

    vecs = jnp.zeros((VEC_ROWS_PAD, VEC_COLS), f32)

    def put(vs, r, v):
        v = jnp.asarray(v, f32).reshape(-1)
        return vs.at[r, :v.shape[0]].set(v)

    vecs = put(vecs, ROW_LN_PRE_G, params["ln_pre_g"])
    vecs = put(vecs, ROW_LN_PRE_B, params["ln_pre_b"])
    vecs = put(vecs, ROW_LN_POST_G, params["ln_post_g"])
    vecs = put(vecs, ROW_LN_POST_B, params["ln_post_b"])

    # per-sequence initializer: CLS+pos[0] on row 0, pos[1:] on patch rows, 0 on pads
    seq_init = jnp.zeros((SEQ_PAD, WIDTH), f32)
    seq_init = seq_init.at[0, :].set(params["cls"] + params["pos"][0])
    seq_init = seq_init.at[1:SEQ, :].set(params["pos"][1:SEQ])
    vecs = vecs.at[ROW_SEQ:ROW_SEQ + SEQ_PAD, :WIDTH].set(seq_init)

    qkv_ws, attn_ws, fc1_ws, fc2_ws = [], [], [], []
    for l, lp in enumerate(params["layers"]):
        base = ROW_LAYER0 + l * ROWS_PER_LAYER
        vecs = put(vecs, base + 0, lp["ln1_g"])
        vecs = put(vecs, base + 1, lp["ln1_b"])
        vecs = put(vecs, base + 2, lp["attn_out_b"])
        vecs = put(vecs, base + 3, lp["ln2_g"])
        vecs = put(vecs, base + 4, lp["ln2_b"])
        vecs = put(vecs, base + 5, lp["fc2_b"])
        # fold 1/sqrt(DH) into the Q third of qkv weight + bias
        vecs = put(vecs, base + 6, lp["qkv_b"].at[:WIDTH].multiply(scale))
        vecs = put(vecs, base + 7, lp["fc1_b"])
        qkv_ws.append(lp["qkv_w"].at[:, :WIDTH].multiply(scale).astype(bf16))
        attn_ws.append(lp["attn_out_w"].astype(bf16))
        fc1_ws.append(lp["fc1_w"].astype(bf16))
        fc2_ws.append(lp["fc2_w"].astype(bf16))

    return {
        "vecs": vecs,
        "w_patch": params["conv1_w"].reshape(WIDTH, cpp).T.astype(bf16),
        "qkv_w": jnp.stack(qkv_ws, axis=0),      # (L, W, 3W)  bf16
        "attn_w": jnp.stack(attn_ws, axis=0),    # (L, W, W)   bf16
        "fc1_w": jnp.stack(fc1_ws, axis=0),      # (L, W, 4W)  bf16
        "fc2_w": jnp.stack(fc2_ws, axis=0),      # (L, 4W, W)  bf16
        "proj": params["proj"].astype(bf16),     # (W, E)      bf16
    }


# ------------------------------- forward pass --------------------------------
def model_to_use_xbm_forward(x_nchw, pk):
    """ModelToUseXBM.forward: F.normalize(HeadXBM(visual(x))[1]) — one fused kernel."""
    B, C, H, W = x_nchw.shape
    gh, gw = H // PATCH, W // PATCH
    n_patch = gh * gw
    cpp = C * PATCH * PATCH

    # patchify NCHW (row-major over (c, ph, pw), matching conv1 weight flattening)
    patches = (
        x_nchw.reshape(B, C, gh, PATCH, gw, PATCH)
        .transpose(0, 2, 4, 1, 3, 5)
        .reshape(B, n_patch, cpp)
    )
    # pad to SEQ_PAD rows per batch: row 0 reserved for CLS, tail rows are padding
    patches_padded = jnp.pad(
        patches, ((0, 0), (1, SEQ_PAD - 1 - n_patch), (0, 0))
    ).reshape(B * SEQ_PAD, cpp).astype(jnp.bfloat16)

    vm = pl.BlockSpec(memory_space=pltpu.MemorySpace.VMEM)
    args = (
        patches_padded, pk["vecs"], pk["w_patch"],
        pk["qkv_w"], pk["attn_w"], pk["fc1_w"], pk["fc2_w"], pk["proj"],
    )
    # NOTE: at B=2 a single VMEM-resident grid-less call is the fastest option on
    # 1-TC chips (v5e/v6e); on v7x a grid=(B,) "parallel" axis would use both TCs.
    return pl.pallas_call(
        _fused_vit_kernel,
        out_shape=jax.ShapeDtypeStruct((B, EMBED_DIM), jnp.float32),
        in_specs=[vm] * len(args),
        out_specs=vm,
    )(*args)


# ----------------------------------- main ------------------------------------
if __name__ == "__main__":
    key = jax.random.PRNGKey(0)
    k_x, k_p = jax.random.split(key)
    x = jax.random.normal(k_x, (BATCH, IN_CH, IMG, IMG), dtype=jnp.float32)  # NCHW
    params = init_params(k_p)
    packed = pack_params(params)

    fwd = jax.jit(model_to_use_xbm_forward)
    out = jax.block_until_ready(fwd(x, packed))

    assert out.shape == (BATCH, EMBED_DIM), out.shape
    # sanity: rows are unit-norm (F.normalize)
    norms = jnp.linalg.norm(out, axis=-1)
    assert bool(jnp.all(jnp.abs(norms - 1.0) < 1e-3)), norms
    print("KERNEL_OK")
</pallas_src>

<mosaic_0001>
module attributes {stable_mosaic.version = 11 : i64} {
  func.func @_fused_vit_kernel(%arg0: memref<16x192xbf16, #tpu.memory_space<vmem>>, %arg1: memref<32x128xf32, #tpu.memory_space<vmem>>, %arg2: memref<192x32xbf16, #tpu.memory_space<vmem>>, %arg3: memref<2x32x96xbf16, #tpu.memory_space<vmem>>, %arg4: memref<2x32x32xbf16, #tpu.memory_space<vmem>>, %arg5: memref<2x32x128xbf16, #tpu.memory_space<vmem>>, %arg6: memref<2x128x32xbf16, #tpu.memory_space<vmem>>, %arg7: memref<32x16xbf16, #tpu.memory_space<vmem>>, %arg8: memref<2x16xf32, #tpu.memory_space<vmem>>) attributes {dimension_semantics = [], scalar_prefetch = 0 : i64, scratch_operands = 0 : i64, tpu.core_type = #tpu.core_type<tc>} {
    %c4 = arith.constant 4 : index
    %c0 = arith.constant 0 : index
    %0 = vector.load %arg1[%c4, %c0] : memref<32x128xf32, #tpu.memory_space<vmem>>, vector<8x32xf32>
    %1 = tpu.concatenate %0, %0 in 0 : vector<8x32xf32>, vector<8x32xf32> -> vector<16x32xf32>
    %c0_0 = arith.constant 0 : index
    %c0_1 = arith.constant 0 : index
    %2 = vector.load %arg0[%c0_0, %c0_1] : memref<16x192xbf16, #tpu.memory_space<vmem>>, vector<16x192xbf16>
    %c0_2 = arith.constant 0 : index
    %c0_3 = arith.constant 0 : index
    %3 = vector.load %arg2[%c0_2, %c0_3] : memref<192x32xbf16, #tpu.memory_space<vmem>>, vector<192x32xbf16>
    %cst = arith.constant dense<0.000000e+00> : vector<16x32xf32>
    %4 = tpu.matmul %2, %3, %cst {dimension_numbers = #tpu.dot_dimension_numbers<[1], [0], [0], [1], [0, 0, 1, 1], [], []>} : vector<16x192xbf16>, vector<192x32xbf16>, vector<16x32xf32> -> vector<16x32xf32>
    %5 = arith.addf %1, %4 : vector<16x32xf32>
    %c0_4 = arith.constant 0 : index
    %c0_5 = arith.constant 0 : index
    %6 = vector.load %arg1[%c0_4, %c0_5] : memref<32x128xf32, #tpu.memory_space<vmem>>, vector<1x32xf32>
    %c1 = arith.constant 1 : index
    %c0_6 = arith.constant 0 : index
    %7 = vector.load %arg1[%c1, %c0_6] : memref<32x128xf32, #tpu.memory_space<vmem>>, vector<1x32xf32>
    %cst_7 = arith.constant dense<0.000000e+00> : vector<16xf32>
    %8 = vector.multi_reduction <add>, %5, %cst_7 [1] : vector<16x32xf32> to vector<16xf32>
    %9 = vector.shape_cast %8 : vector<16xf32> to vector<16x1xf32>
    %cst_8 = arith.constant 3.200000e+01 : f32
    %10 = vector.broadcast %cst_8 : f32 to vector<16x1xf32>
    %11 = arith.divf %9, %10 : vector<16x1xf32>
    %12 = vector.broadcast %11 : vector<16x1xf32> to vector<16x32xf32>
    %13 = arith.subf %5, %12 : vector<16x32xf32>
    %14 = arith.mulf %13, %13 : vector<16x32xf32>
    %cst_9 = arith.constant dense<0.000000e+00> : vector<16xf32>
    %15 = vector.multi_reduction <add>, %14, %cst_9 [1] : vector<16x32xf32> to vector<16xf32>
    %16 = vector.shape_cast %15 : vector<16xf32> to vector<16x1xf32>
    %cst_10 = arith.constant 3.200000e+01 : f32
    %17 = vector.broadcast %cst_10 : f32 to vector<16x1xf32>
    %18 = arith.divf %16, %17 : vector<16x1xf32>
    %19 = vector.broadcast %11 : vector<16x1xf32> to vector<16x32xf32>
    %20 = arith.subf %5, %19 : vector<16x32xf32>
    %cst_11 = arith.constant 9.99999974E-6 : f32
    %21 = vector.broadcast %cst_11 : f32 to vector<16x1xf32>
    %22 = arith.addf %18, %21 : vector<16x1xf32>
    %23 = math.rsqrt %22 : vector<16x1xf32>
    %24 = vector.broadcast %23 : vector<16x1xf32> to vector<16x32xf32>
    %25 = arith.mulf %20, %24 : vector<16x32xf32>
    %26 = vector.broadcast %6 : vector<1x32xf32> to vector<16x32xf32>
    %27 = arith.mulf %25, %26 : vector<16x32xf32>
    %28 = vector.broadcast %7 : vector<1x32xf32> to vector<16x32xf32>
    %29 = arith.addf %27, %28 : vector<16x32xf32>
    %30 = tpu.iota {dimensions = array<i32: 1>} : vector<8x8xi32>
    %c5_i32 = arith.constant 5 : i32
    %31 = vector.broadcast %c5_i32 : i32 to vector<8x8xi32>
    %32 = arith.cmpi slt, %30, %31 : vector<8x8xi32>
    %cst_12 = arith.constant 0.000000e+00 : f32
    %cst_13 = arith.constant -1.000000e+30 : f32
    %33 = vector.broadcast %cst_12 : f32 to vector<8x8xf32>
    %34 = vector.broadcast %cst_13 : f32 to vector<8x8xf32>
    %35 = arith.select %32, %33, %34 : vector<8x8xi1>, vector<8x8xf32>
    %c12 = arith.constant 12 : index
    %c0_14 = arith.constant 0 : index
    %36 = vector.load %arg1[%c12, %c0_14] : memref<32x128xf32, #tpu.memory_space<vmem>>, vector<1x32xf32>
    %c13 = arith.constant 13 : index
    %c0_15 = arith.constant 0 : index
    %37 = vector.load %arg1[%c13, %c0_15] : memref<32x128xf32, #tpu.memory_space<vmem>>, vector<1x32xf32>
    %cst_16 = arith.constant dense<0.000000e+00> : vector<16xf32>
    %38 = vector.multi_reduction <add>, %29, %cst_16 [1] : vector<16x32xf32> to vector<16xf32>
    %39 = vector.shape_cast %38 : vector<16xf32> to vector<16x1xf32>
    %cst_17 = arith.constant 3.200000e+01 : f32
    %40 = vector.broadcast %cst_17 : f32 to vector<16x1xf32>
    %41 = arith.divf %39, %40 : vector<16x1xf32>
    %42 = vector.broadcast %41 : vector<16x1xf32> to vector<16x32xf32>
    %43 = arith.subf %29, %42 : vector<16x32xf32>
    %44 = arith.mulf %43, %43 : vector<16x32xf32>
    %cst_18 = arith.constant dense<0.000000e+00> : vector<16xf32>
    %45 = vector.multi_reduction <add>, %44, %cst_18 [1] : vector<16x32xf32> to vector<16xf32>
    %46 = vector.shape_cast %45 : vector<16xf32> to vector<16x1xf32>
    %cst_19 = arith.constant 3.200000e+01 : f32
    %47 = vector.broadcast %cst_19 : f32 to vector<16x1xf32>
    %48 = arith.divf %46, %47 : vector<16x1xf32>
    %49 = vector.broadcast %41 : vector<16x1xf32> to vector<16x32xf32>
    %50 = arith.subf %29, %49 : vector<16x32xf32>
    %cst_20 = arith.constant 9.99999974E-6 : f32
    %51 = vector.broadcast %cst_20 : f32 to vector<16x1xf32>
    %52 = arith.addf %48, %51 : vector<16x1xf32>
    %53 = math.rsqrt %52 : vector<16x1xf32>
    %54 = vector.broadcast %53 : vector<16x1xf32> to vector<16x32xf32>
    %55 = arith.mulf %50, %54 : vector<16x32xf32>
    %56 = vector.broadcast %36 : vector<1x32xf32> to vector<16x32xf32>
    %57 = arith.mulf %55, %56 : vector<16x32xf32>
    %58 = vector.broadcast %37 : vector<1x32xf32> to vector<16x32xf32>
    %59 = arith.addf %57, %58 : vector<16x32xf32>
    %c0_21 = arith.constant 0 : index
    %c0_22 = arith.constant 0 : index
    %c0_23 = arith.constant 0 : index
    %60 = vector.load %arg3[%c0_21, %c0_22, %c0_23] : memref<2x32x96xbf16, #tpu.memory_space<vmem>>, vector<1x32x96xbf16>
    %61 = vector.shape_cast %60 : vector<1x32x96xbf16> to vector<32x96xbf16>
    %62 = arith.truncf %59 : vector<16x32xf32> to vector<16x32xbf16>
    %cst_24 = arith.constant dense<0.000000e+00> : vector<16x96xf32>
    %63 = tpu.matmul %62, %61, %cst_24 {dimension_numbers = #tpu.dot_dimension_numbers<[1], [0], [0], [1], [0, 0, 1, 1], [], []>} : vector<16x32xbf16>, vector<32x96xbf16>, vector<16x96xf32> -> vector<16x96xf32>
    %c18 = arith.constant 18 : index
    %c0_25 = arith.constant 0 : index
    %64 = vector.load %arg1[%c18, %c0_25] : memref<32x128xf32, #tpu.memory_space<vmem>>, vector<1x96xf32>
    %65 = vector.broadcast %64 : vector<1x96xf32> to vector<16x96xf32>
    %66 = arith.addf %63, %65 : vector<16x96xf32>
    %67 = arith.truncf %66 : vector<16x96xf32> to vector<16x96xbf16>
    %68 = vector.extract_strided_slice %67 {offsets = [0, 0], sizes = [8, 96], strides = [1, 1]} : vector<16x96xbf16> to vector<8x96xbf16>
    %69 = vector.extract_strided_slice %68 {offsets = [0, 0], sizes = [8, 16], strides = [1, 1]} : vector<8x96xbf16> to vector<8x16xbf16>
    %70 = vector.extract_strided_slice %68 {offsets = [0, 32], sizes = [8, 16], strides = [1, 1]} : vector<8x96xbf16> to vector<8x16xbf16>
    %71 = vector.extract_strided_slice %68 {offsets = [0, 64], sizes = [8, 16], strides = [1, 1]} : vector<8x96xbf16> to vector<8x16xbf16>
    %72 = vector.extract_strided_slice %68 {offsets = [0, 16], sizes = [8, 16], strides = [1, 1]} : vector<8x96xbf16> to vector<8x16xbf16>
    %73 = vector.extract_strided_slice %68 {offsets = [0, 48], sizes = [8, 16], strides = [1, 1]} : vector<8x96xbf16> to vector<8x16xbf16>
    %74 = vector.extract_strided_slice %68 {offsets = [0, 80], sizes = [8, 16], strides = [1, 1]} : vector<8x96xbf16> to vector<8x16xbf16>
    %75 = vector.extract_strided_slice %67 {offsets = [8, 0], sizes = [8, 96], strides = [1, 1]} : vector<16x96xbf16> to vector<8x96xbf16>
    %76 = vector.extract_strided_slice %75 {offsets = [0, 0], sizes = [8, 16], strides = [1, 1]} : vector<8x96xbf16> to vector<8x16xbf16>
    %77 = vector.extract_strided_slice %75 {offsets = [0, 32], sizes = [8, 16], strides = [1, 1]} : vector<8x96xbf16> to vector<8x16xbf16>
    %78 = vector.extract_strided_slice %75 {offsets = [0, 64], sizes = [8, 16], strides = [1, 1]} : vector<8x96xbf16> to vector<8x16xbf16>
    %79 = vector.extract_strided_slice %75 {offsets = [0, 16], sizes = [8, 16], strides = [1, 1]} : vector<8x96xbf16> to vector<8x16xbf16>
    %80 = vector.extract_strided_slice %75 {offsets = [0, 48], sizes = [8, 16], strides = [1, 1]} : vector<8x96xbf16> to vector<8x16xbf16>
    %81 = vector.extract_strided_slice %75 {offsets = [0, 80], sizes = [8, 16], strides = [1, 1]} : vector<8x96xbf16> to vector<8x16xbf16>
    %82 = vector.shape_cast %69 : vector<8x16xbf16> to vector<1x8x16xbf16>
    %83 = vector.shape_cast %72 : vector<8x16xbf16> to vector<1x8x16xbf16>
    %84 = vector.shape_cast %76 : vector<8x16xbf16> to vector<1x8x16xbf16>
    %85 = vector.shape_cast %79 : vector<8x16xbf16> to vector<1x8x16xbf16>
    %86 = tpu.concatenate %82, %83, %84, %85 in 0 : vector<1x8x16xbf16>, vector<1x8x16xbf16>, vector<1x8x16xbf16>, vector<1x8x16xbf16> -> vector<4x8x16xbf16>
    %87 = vector.shape_cast %70 : vector<8x16xbf16> to vector<1x8x16xbf16>
    %88 = vector.shape_cast %73 : vector<8x16xbf16> to vector<1x8x16xbf16>
    %89 = vector.shape_cast %77 : vector<8x16xbf16> to vector<1x8x16xbf16>
    %90 = vector.shape_cast %80 : vector<8x16xbf16> to vector<1x8x16xbf16>
    %91 = tpu.concatenate %87, %88, %89, %90 in 0 : vector<1x8x16xbf16>, vector<1x8x16xbf16>, vector<1x8x16xbf16>, vector<1x8x16xbf16> -> vector<4x8x16xbf16>
    %92 = vector.shape_cast %71 : vector<8x16xbf16> to vector<1x8x16xbf16>
    %93 = vector.shape_cast %74 : vector<8x16xbf16> to vector<1x8x16xbf16>
    %94 = vector.shape_cast %78 : vector<8x16xbf16> to vector<1x8x16xbf16>
    %95 = vector.shape_cast %81 : vector<8x16xbf16> to vector<1x8x16xbf16>
    %96 = tpu.concatenate %92, %93, %94, %95 in 0 : vector<1x8x16xbf16>, vector<1x8x16xbf16>, vector<1x8x16xbf16>, vector<1x8x16xbf16> -> vector<4x8x16xbf16>
    "tpu.trace_start"() <{level = 10 : i32, message = "bqd,bkd->bqk"}> : () -> ()
    %cst_26 = arith.constant dense<0.000000e+00> : vector<4x8x8xf32>
    %97 = tpu.matmul %86, %91, %cst_26 {dimension_numbers = #tpu.dot_dimension_numbers<[2], [2], [1], [1], [0, 0, 0, 1, 1, 1], [0], [0]>} : vector<4x8x16xbf16>, vector<4x8x16xbf16>, vector<4x8x8xf32> -> vector<4x8x8xf32>
    "tpu.trace_stop"() : () -> ()
    %98 = vector.shape_cast %35 : vector<8x8xf32> to vector<1x8x8xf32>
    %99 = vector.broadcast %98 : vector<1x8x8xf32> to vector<4x8x8xf32>
    %100 = arith.addf %97, %99 : vector<4x8x8xf32>
    %cst_27 = arith.constant dense<0xFF800000> : vector<4x8xf32>
    %101 = vector.multi_reduction <maximumf>, %100, %cst_27 [2] : vector<4x8x8xf32> to vector<4x8xf32>
    %102 = vector.shape_cast %101 : vector<4x8xf32> to vector<4x8x1xf32>
    %103 = vector.broadcast %102 : vector<4x8x1xf32> to vector<4x8x8xf32>
    %104 = arith.subf %100, %103 : vector<4x8x8xf32>
    %105 = math.exp %104 : vector<4x8x8xf32>
    %cst_28 = arith.constant dense<0.000000e+00> : vector<4x8xf32>
    %106 = vector.multi_reduction <add>, %105, %cst_28 [2] : vector<4x8x8xf32> to vector<4x8xf32>
    %107 = vector.shape_cast %106 : vector<4x8xf32> to vector<4x8x1xf32>
    %108 = tpu.reciprocal %107 {approx = true} : vector<4x8x1xf32> -> vector<4x8x1xf32>
    %109 = vector.broadcast %108 : vector<4x8x1xf32> to vector<4x8x8xf32>
    %110 = arith.mulf %105, %109 : vector<4x8x8xf32>
    %111 = arith.truncf %110 : vector<4x8x8xf32> to vector<4x8x8xbf16>
    "tpu.trace_start"() <{level = 10 : i32, message = "bqk,bkd->bqd"}> : () -> ()
    %cst_29 = arith.constant dense<0.000000e+00> : vector<4x8x16xf32>
    %112 = tpu.matmul %111, %96, %cst_29 {dimension_numbers = #tpu.dot_dimension_numbers<[2], [1], [1], [2], [0, 0, 0, 1, 1, 2], [0], [0]>} : vector<4x8x8xbf16>, vector<4x8x16xbf16>, vector<4x8x16xf32> -> vector<4x8x16xf32>
    "tpu.trace_stop"() : () -> ()
    %113 = vector.extract_strided_slice %112 {offsets = [0, 0, 0], sizes = [1, 8, 16], strides = [1, 1, 1]} : vector<4x8x16xf32> to vector<1x8x16xf32>
    %114 = vector.shape_cast %113 : vector<1x8x16xf32> to vector<8x16xf32>
    %115 = vector.extract_strided_slice %112 {offsets = [1, 0, 0], sizes = [1, 8, 16], strides = [1, 1, 1]} : vector<4x8x16xf32> to vector<1x8x16xf32>
    %116 = vector.shape_cast %115 : vector<1x8x16xf32> to vector<8x16xf32>
    %117 = tpu.concatenate %114, %116 in 1 : vector<8x16xf32>, vector<8x16xf32> -> vector<8x32xf32>
    %118 = vector.extract_strided_slice %112 {offsets = [2, 0, 0], sizes = [1, 8, 16], strides = [1, 1, 1]} : vector<4x8x16xf32> to vector<1x8x16xf32>
    %119 = vector.shape_cast %118 : vector<1x8x16xf32> to vector<8x16xf32>
    %120 = vector.extract_strided_slice %112 {offsets = [3, 0, 0], sizes = [1, 8, 16], strides = [1, 1, 1]} : vector<4x8x16xf32> to vector<1x8x16xf32>
    %121 = vector.shape_cast %120 : vector<1x8x16xf32> to vector<8x16xf32>
    %122 = tpu.concatenate %119, %121 in 1 : vector<8x16xf32>, vector<8x16xf32> -> vector<8x32xf32>
    %123 = tpu.concatenate %117, %122 in 0 : vector<8x32xf32>, vector<8x32xf32> -> vector<16x32xf32>
    %c0_30 = arith.constant 0 : index
    %c0_31 = arith.constant 0 : index
    %c0_32 = arith.constant 0 : index
    %124 = vector.load %arg4[%c0_30, %c0_31, %c0_32] : memref<2x32x32xbf16, #tpu.memory_space<vmem>>, vector<1x32x32xbf16>
    %125 = vector.shape_cast %124 : vector<1x32x32xbf16> to vector<32x32xbf16>
    %126 = arith.truncf %123 : vector<16x32xf32> to vector<16x32xbf16>
    %cst_33 = arith.constant dense<0.000000e+00> : vector<16x32xf32>
    %127 = tpu.matmul %126, %125, %cst_33 {dimension_numbers = #tpu.dot_dimension_numbers<[1], [0], [0], [1], [0, 0, 1, 1], [], []>} : vector<16x32xbf16>, vector<32x32xbf16>, vector<16x32xf32> -> vector<16x32xf32>
    %128 = arith.addf %29, %127 : vector<16x32xf32>
    %c14 = arith.constant 14 : index
    %c0_34 = arith.constant 0 : index
    %129 = vector.load %arg1[%c14, %c0_34] : memref<32x128xf32, #tpu.memory_space<vmem>>, vector<1x32xf32>
    %130 = vector.broadcast %129 : vector<1x32xf32> to vector<16x32xf32>
    %131 = arith.addf %128, %130 : vector<16x32xf32>
    %c15 = arith.constant 15 : index
    %c0_35 = arith.constant 0 : index
    %132 = vector.load %arg1[%c15, %c0_35] : memref<32x128xf32, #tpu.memory_space<vmem>>, vector<1x32xf32>
    %c16 = arith.constant 16 : index
    %c0_36 = arith.constant 0 : index
    %133 = vector.load %arg1[%c16, %c0_36] : memref<32x128xf32, #tpu.memory_space<vmem>>, vector<1x32xf32>
    %cst_37 = arith.constant dense<0.000000e+00> : vector<16xf32>
    %134 = vector.multi_reduction <add>, %131, %cst_37 [1] : vector<16x32xf32> to vector<16xf32>
    %135 = vector.shape_cast %134 : vector<16xf32> to vector<16x1xf32>
    %cst_38 = arith.constant 3.200000e+01 : f32
    %136 = vector.broadcast %cst_38 : f32 to vector<16x1xf32>
    %137 = arith.divf %135, %136 : vector<16x1xf32>
    %138 = vector.broadcast %137 : vector<16x1xf32> to vector<16x32xf32>
    %139 = arith.subf %131, %138 : vector<16x32xf32>
    %140 = arith.mulf %139, %139 : vector<16x32xf32>
    %cst_39 = arith.constant dense<0.000000e+00> : vector<16xf32>
    %141 = vector.multi_reduction <add>, %140, %cst_39 [1] : vector<16x32xf32> to vector<16xf32>
    %142 = vector.shape_cast %141 : vector<16xf32> to vector<16x1xf32>
    %cst_40 = arith.constant 3.200000e+01 : f32
    %143 = vector.broadcast %cst_40 : f32 to vector<16x1xf32>
    %144 = arith.divf %142, %143 : vector<16x1xf32>
    %145 = vector.broadcast %137 : vector<16x1xf32> to vector<16x32xf32>
    %146 = arith.subf %131, %145 : vector<16x32xf32>
    %cst_41 = arith.constant 9.99999974E-6 : f32
    %147 = vector.broadcast %cst_41 : f32 to vector<16x1xf32>
    %148 = arith.addf %144, %147 : vector<16x1xf32>
    %149 = math.rsqrt %148 : vector<16x1xf32>
    %150 = vector.broadcast %149 : vector<16x1xf32> to vector<16x32xf32>
    %151 = arith.mulf %146, %150 : vector<16x32xf32>
    %152 = vector.broadcast %132 : vector<1x32xf32> to vector<16x32xf32>
    %153 = arith.mulf %151, %152 : vector<16x32xf32>
    %154 = vector.broadcast %133 : vector<1x32xf32> to vector<16x32xf32>
    %155 = arith.addf %153, %154 : vector<16x32xf32>
    %c0_42 = arith.constant 0 : index
    %c0_43 = arith.constant 0 : index
    %c0_44 = arith.constant 0 : index
    %156 = vector.load %arg5[%c0_42, %c0_43, %c0_44] : memref<2x32x128xbf16, #tpu.memory_space<vmem>>, vector<1x32x128xbf16>
    %157 = vector.shape_cast %156 : vector<1x32x128xbf16> to vector<32x128xbf16>
    %158 = arith.truncf %155 : vector<16x32xf32> to vector<16x32xbf16>
    %cst_45 = arith.constant dense<0.000000e+00> : vector<16x128xf32>
    %159 = tpu.matmul %158, %157, %cst_45 {dimension_numbers = #tpu.dot_dimension_numbers<[1], [0], [0], [1], [0, 0, 1, 1], [], []>} : vector<16x32xbf16>, vector<32x128xbf16>, vector<16x128xf32> -> vector<16x128xf32>
    %c19 = arith.constant 19 : index
    %c0_46 = arith.constant 0 : index
    %160 = vector.load %arg1[%c19, %c0_46] : memref<32x128xf32, #tpu.memory_space<vmem>>, vector<1x128xf32>
    %161 = vector.broadcast %160 : vector<1x128xf32> to vector<16x128xf32>
    %162 = arith.addf %159, %161 : vector<16x128xf32>
    %cst_47 = arith.constant 1.702000e+00 : f32
    %163 = vector.broadcast %cst_47 : f32 to vector<16x128xf32>
    %164 = arith.mulf %163, %162 : vector<16x128xf32>
    %165 = arith.negf %164 : vector<16x128xf32>
    %166 = math.exp %165 : vector<16x128xf32>
    %cst_48 = arith.constant 1.000000e+00 : f32
    %167 = vector.broadcast %cst_48 : f32 to vector<16x128xf32>
    %168 = arith.addf %167, %166 : vector<16x128xf32>
    %169 = arith.divf %167, %168 : vector<16x128xf32>
    %170 = arith.mulf %162, %169 : vector<16x128xf32>
    %c0_49 = arith.constant 0 : index
    %c0_50 = arith.constant 0 : index
    %c0_51 = arith.constant 0 : index
    %171 = vector.load %arg6[%c0_49, %c0_50, %c0_51] : memref<2x128x32xbf16, #tpu.memory_space<vmem>>, vector<1x128x32xbf16>
    %172 = vector.shape_cast %171 : vector<1x128x32xbf16> to vector<128x32xbf16>
    %173 = arith.truncf %170 : vector<16x128xf32> to vector<16x128xbf16>
    %cst_52 = arith.constant dense<0.000000e+00> : vector<16x32xf32>
    %174 = tpu.matmul %173, %172, %cst_52 {dimension_numbers = #tpu.dot_dimension_numbers<[1], [0], [0], [1], [0, 0, 1, 1], [], []>} : vector<16x128xbf16>, vector<128x32xbf16>, vector<16x32xf32> -> vector<16x32xf32>
    %175 = arith.addf %131, %174 : vector<16x32xf32>
    %c17 = arith.constant 17 : index
    %c0_53 = arith.constant 0 : index
    %176 = vector.load %arg1[%c17, %c0_53] : memref<32x128xf32, #tpu.memory_space<vmem>>, vector<1x32xf32>
    %177 = vector.broadcast %176 : vector<1x32xf32> to vector<16x32xf32>
    %178 = arith.addf %175, %177 : vector<16x32xf32>
    %c20 = arith.constant 20 : index
    %c0_54 = arith.constant 0 : index
    %179 = vector.load %arg1[%c20, %c0_54] : memref<32x128xf32, #tpu.memory_space<vmem>>, vector<1x32xf32>
    %c21 = arith.constant 21 : index
    %c0_55 = arith.constant 0 : index
    %180 = vector.load %arg1[%c21, %c0_55] : memref<32x128xf32, #tpu.memory_space<vmem>>, vector<1x32xf32>
    %cst_56 = arith.constant dense<0.000000e+00> : vector<16xf32>
    %181 = vector.multi_reduction <add>, %178, %cst_56 [1] : vector<16x32xf32> to vector<16xf32>
    %182 = vector.shape_cast %181 : vector<16xf32> to vector<16x1xf32>
    %cst_57 = arith.constant 3.200000e+01 : f32
    %183 = vector.broadcast %cst_57 : f32 to vector<16x1xf32>
    %184 = arith.divf %182, %183 : vector<16x1xf32>
    %185 = vector.broadcast %184 : vector<16x1xf32> to vector<16x32xf32>
    %186 = arith.subf %178, %185 : vector<16x32xf32>
    %187 = arith.mulf %186, %186 : vector<16x32xf32>
    %cst_58 = arith.constant dense<0.000000e+00> : vector<16xf32>
    %188 = vector.multi_reduction <add>, %187, %cst_58 [1] : vector<16x32xf32> to vector<16xf32>
    %189 = vector.shape_cast %188 : vector<16xf32> to vector<16x1xf32>
    %cst_59 = arith.constant 3.200000e+01 : f32
    %190 = vector.broadcast %cst_59 : f32 to vector<16x1xf32>
    %191 = arith.divf %189, %190 : vector<16x1xf32>
    %192 = vector.broadcast %184 : vector<16x1xf32> to vector<16x32xf32>
    %193 = arith.subf %178, %192 : vector<16x32xf32>
    %cst_60 = arith.constant 9.99999974E-6 : f32
    %194 = vector.broadcast %cst_60 : f32 to vector<16x1xf32>
    %195 = arith.addf %191, %194 : vector<16x1xf32>
    %196 = math.rsqrt %195 : vector<16x1xf32>
    %197 = vector.broadcast %196 : vector<16x1xf32> to vector<16x32xf32>
    %198 = arith.mulf %193, %197 : vector<16x32xf32>
    %199 = vector.broadcast %179 : vector<1x32xf32> to vector<16x32xf32>
    %200 = arith.mulf %198, %199 : vector<16x32xf32>
    %201 = vector.broadcast %180 : vector<1x32xf32> to vector<16x32xf32>
    %202 = arith.addf %200, %201 : vector<16x32xf32>
    %c1_61 = arith.constant 1 : index
    %c0_62 = arith.constant 0 : index
    %c0_63 = arith.constant 0 : index
    %203 = vector.load %arg3[%c1_61, %c0_62, %c0_63] : memref<2x32x96xbf16, #tpu.memory_space<vmem>>, vector<1x32x96xbf16>
    %204 = vector.shape_cast %203 : vector<1x32x96xbf16> to vector<32x96xbf16>
    %205 = arith.truncf %202 : vector<16x32xf32> to vector<16x32xbf16>
    %cst_64 = arith.constant dense<0.000000e+00> : vector<16x96xf32>
    %206 = tpu.matmul %205, %204, %cst_64 {dimension_numbers = #tpu.dot_dimension_numbers<[1], [0], [0], [1], [0, 0, 1, 1], [], []>} : vector<16x32xbf16>, vector<32x96xbf16>, vector<16x96xf32> -> vector<16x96xf32>
    %c26 = arith.constant 26 : index
    %c0_65 = arith.constant 0 : index
    %207 = vector.load %arg1[%c26, %c0_65] : memref<32x128xf32, #tpu.memory_space<vmem>>, vector<1x96xf32>
    %208 = vector.broadcast %207 : vector<1x96xf32> to vector<16x96xf32>
    %209 = arith.addf %206, %208 : vector<16x96xf32>
    %210 = arith.truncf %209 : vector<16x96xf32> to vector<16x96xbf16>
    %211 = vector.extract_strided_slice %210 {offsets = [0, 0], sizes = [8, 96], strides = [1, 1]} : vector<16x96xbf16> to vector<8x96xbf16>
    %212 = vector.extract_strided_slice %211 {offsets = [0, 0], sizes = [8, 16], strides = [1, 1]} : vector<8x96xbf16> to vector<8x16xbf16>
    %213 = vector.extract_strided_slice %211 {offsets = [0, 32], sizes = [8, 16], strides = [1, 1]} : vector<8x96xbf16> to vector<8x16xbf16>
    %214 = vector.extract_strided_slice %211 {offsets = [0, 64], sizes = [8, 16], strides = [1, 1]} : vector<8x96xbf16> to vector<8x16xbf16>
    %215 = vector.extract_strided_slice %211 {offsets = [0, 16], sizes = [8, 16], strides = [1, 1]} : vector<8x96xbf16> to vector<8x16xbf16>
    %216 = vector.extract_strided_slice %211 {offsets = [0, 48], sizes = [8, 16], strides = [1, 1]} : vector<8x96xbf16> to vector<8x16xbf16>
    %217 = vector.extract_strided_slice %211 {offsets = [0, 80], sizes = [8, 16], strides = [1, 1]} : vector<8x96xbf16> to vector<8x16xbf16>
    %218 = vector.extract_strided_slice %210 {offsets = [8, 0], sizes = [8, 96], strides = [1, 1]} : vector<16x96xbf16> to vector<8x96xbf16>
    %219 = vector.extract_strided_slice %218 {offsets = [0, 0], sizes = [8, 16], strides = [1, 1]} : vector<8x96xbf16> to vector<8x16xbf16>
    %220 = vector.extract_strided_slice %218 {offsets = [0, 32], sizes = [8, 16], strides = [1, 1]} : vector<8x96xbf16> to vector<8x16xbf16>
    %221 = vector.extract_strided_slice %218 {offsets = [0, 64], sizes = [8, 16], strides = [1, 1]} : vector<8x96xbf16> to vector<8x16xbf16>
    %222 = vector.extract_strided_slice %218 {offsets = [0, 16], sizes = [8, 16], strides = [1, 1]} : vector<8x96xbf16> to vector<8x16xbf16>
    %223 = vector.extract_strided_slice %218 {offsets = [0, 48], sizes = [8, 16], strides = [1, 1]} : vector<8x96xbf16> to vector<8x16xbf16>
    %224 = vector.extract_strided_slice %218 {offsets = [0, 80], sizes = [8, 16], strides = [1, 1]} : vector<8x96xbf16> to vector<8x16xbf16>
    %225 = vector.shape_cast %212 : vector<8x16xbf16> to vector<1x8x16xbf16>
    %226 = vector.shape_cast %215 : vector<8x16xbf16> to vector<1x8x16xbf16>
    %227 = vector.shape_cast %219 : vector<8x16xbf16> to vector<1x8x16xbf16>
    %228 = vector.shape_cast %222 : vector<8x16xbf16> to vector<1x8x16xbf16>
    %229 = tpu.concatenate %225, %226, %227, %228 in 0 : vector<1x8x16xbf16>, vector<1x8x16xbf16>, vector<1x8x16xbf16>, vector<1x8x16xbf16> -> vector<4x8x16xbf16>
    %230 = vector.shape_cast %213 : vector<8x16xbf16> to vector<1x8x16xbf16>
    %231 = vector.shape_cast %216 : vector<8x16xbf16> to vector<1x8x16xbf16>
    %232 = vector.shape_cast %220 : vector<8x16xbf16> to vector<1x8x16xbf16>
    %233 = vector.shape_cast %223 : vector<8x16xbf16> to vector<1x8x16xbf16>
    %234 = tpu.concatenate %230, %231, %232, %233 in 0 : vector<1x8x16xbf16>, vector<1x8x16xbf16>, vector<1x8x16xbf16>, vector<1x8x16xbf16> -> vector<4x8x16xbf16>
    %235 = vector.shape_cast %214 : vector<8x16xbf16> to vector<1x8x16xbf16>
    %236 = vector.shape_cast %217 : vector<8x16xbf16> to vector<1x8x16xbf16>
    %237 = vector.shape_cast %221 : vector<8x16xbf16> to vector<1x8x16xbf16>
    %238 = vector.shape_cast %224 : vector<8x16xbf16> to vector<1x8x16xbf16>
    %239 = tpu.concatenate %235, %236, %237, %238 in 0 : vector<1x8x16xbf16>, vector<1x8x16xbf16>, vector<1x8x16xbf16>, vector<1x8x16xbf16> -> vector<4x8x16xbf16>
    "tpu.trace_start"() <{level = 10 : i32, message = "bqd,bkd->bqk"}> : () -> ()
    %cst_66 = arith.constant dense<0.000000e+00> : vector<4x8x8xf32>
    %240 = tpu.matmul %229, %234, %cst_66 {dimension_numbers = #tpu.dot_dimension_numbers<[2], [2], [1], [1], [0, 0, 0, 1, 1, 1], [0], [0]>} : vector<4x8x16xbf16>, vector<4x8x16xbf16>, vector<4x8x8xf32> -> vector<4x8x8xf32>
    "tpu.trace_stop"() : () -> ()
    %241 = vector.shape_cast %35 : vector<8x8xf32> to vector<1x8x8xf32>
    %242 = vector.broadcast %241 : vector<1x8x8xf32> to vector<4x8x8xf32>
    %243 = arith.addf %240, %242 : vector<4x8x8xf32>
    %cst_67 = arith.constant dense<0xFF800000> : vector<4x8xf32>
    %244 = vector.multi_reduction <maximumf>, %243, %cst_67 [2] : vector<4x8x8xf32> to vector<4x8xf32>
    %245 = vector.shape_cast %244 : vector<4x8xf32> to vector<4x8x1xf32>
    %246 = vector.broadcast %245 : vector<4x8x1xf32> to vector<4x8x8xf32>
    %247 = arith.subf %243, %246 : vector<4x8x8xf32>
    %248 = math.exp %247 : vector<4x8x8xf32>
    %cst_68 = arith.constant dense<0.000000e+00> : vector<4x8xf32>
    %249 = vector.multi_reduction <add>, %248, %cst_68 [2] : vector<4x8x8xf32> to vector<4x8xf32>
    %250 = vector.shape_cast %249 : vector<4x8xf32> to vector<4x8x1xf32>
    %251 = tpu.reciprocal %250 {approx = true} : vector<4x8x1xf32> -> vector<4x8x1xf32>
    %252 = vector.broadcast %251 : vector<4x8x1xf32> to vector<4x8x8xf32>
    %253 = arith.mulf %248, %252 : vector<4x8x8xf32>
    %254 = arith.truncf %253 : vector<4x8x8xf32> to vector<4x8x8xbf16>
    "tpu.trace_start"() <{level = 10 : i32, message = "bqk,bkd->bqd"}> : () -> ()
    %cst_69 = arith.constant dense<0.000000e+00> : vector<4x8x16xf32>
    %255 = tpu.matmul %254, %239, %cst_69 {dimension_numbers = #tpu.dot_dimension_numbers<[2], [1], [1], [2], [0, 0, 0, 1, 1, 2], [0], [0]>} : vector<4x8x8xbf16>, vector<4x8x16xbf16>, vector<4x8x16xf32> -> vector<4x8x16xf32>
    "tpu.trace_stop"() : () -> ()
    %256 = vector.extract_strided_slice %255 {offsets = [0, 0, 0], sizes = [1, 8, 16], strides = [1, 1, 1]} : vector<4x8x16xf32> to vector<1x8x16xf32>
    %257 = vector.shape_cast %256 : vector<1x8x16xf32> to vector<8x16xf32>
    %258 = vector.extract_strided_slice %255 {offsets = [1, 0, 0], sizes = [1, 8, 16], strides = [1, 1, 1]} : vector<4x8x16xf32> to vector<1x8x16xf32>
    %259 = vector.shape_cast %258 : vector<1x8x16xf32> to vector<8x16xf32>
    %260 = tpu.concatenate %257, %259 in 1 : vector<8x16xf32>, vector<8x16xf32> -> vector<8x32xf32>
    %261 = vector.extract_strided_slice %255 {offsets = [2, 0, 0], sizes = [1, 8, 16], strides = [1, 1, 1]} : vector<4x8x16xf32> to vector<1x8x16xf32>
    %262 = vector.shape_cast %261 : vector<1x8x16xf32> to vector<8x16xf32>
    %263 = vector.extract_strided_slice %255 {offsets = [3, 0, 0], sizes = [1, 8, 16], strides = [1, 1, 1]} : vector<4x8x16xf32> to vector<1x8x16xf32>
    %264 = vector.shape_cast %263 : vector<1x8x16xf32> to vector<8x16xf32>
    %265 = tpu.concatenate %262, %264 in 1 : vector<8x16xf32>, vector<8x16xf32> -> vector<8x32xf32>
    %266 = tpu.concatenate %260, %265 in 0 : vector<8x32xf32>, vector<8x32xf32> -> vector<16x32xf32>
    %c1_70 = arith.constant 1 : index
    %c0_71 = arith.constant 0 : index
    %c0_72 = arith.constant 0 : index
    %267 = vector.load %arg4[%c1_70, %c0_71, %c0_72] : memref<2x32x32xbf16, #tpu.memory_space<vmem>>, vector<1x32x32xbf16>
    %268 = vector.shape_cast %267 : vector<1x32x32xbf16> to vector<32x32xbf16>
    %269 = arith.truncf %266 : vector<16x32xf32> to vector<16x32xbf16>
    %cst_73 = arith.constant dense<0.000000e+00> : vector<16x32xf32>
    %270 = tpu.matmul %269, %268, %cst_73 {dimension_numbers = #tpu.dot_dimension_numbers<[1], [0], [0], [1], [0, 0, 1, 1], [], []>} : vector<16x32xbf16>, vector<32x32xbf16>, vector<16x32xf32> -> vector<16x32xf32>
    %271 = arith.addf %178, %270 : vector<16x32xf32>
    %c22 = arith.constant 22 : index
    %c0_74 = arith.constant 0 : index
    %272 = vector.load %arg1[%c22, %c0_74] : memref<32x128xf32, #tpu.memory_space<vmem>>, vector<1x32xf32>
    %273 = vector.broadcast %272 : vector<1x32xf32> to vector<16x32xf32>
    %274 = arith.addf %271, %273 : vector<16x32xf32>
    %c23 = arith.constant 23 : index
    %c0_75 = arith.constant 0 : index
    %275 = vector.load %arg1[%c23, %c0_75] : memref<32x128xf32, #tpu.memory_space<vmem>>, vector<1x32xf32>
    %c24 = arith.constant 24 : index
    %c0_76 = arith.constant 0 : index
    %276 = vector.load %arg1[%c24, %c0_76] : memref<32x128xf32, #tpu.memory_space<vmem>>, vector<1x32xf32>
    %cst_77 = arith.constant dense<0.000000e+00> : vector<16xf32>
    %277 = vector.multi_reduction <add>, %274, %cst_77 [1] : vector<16x32xf32> to vector<16xf32>
    %278 = vector.shape_cast %277 : vector<16xf32> to vector<16x1xf32>
    %cst_78 = arith.constant 3.200000e+01 : f32
    %279 = vector.broadcast %cst_78 : f32 to vector<16x1xf32>
    %280 = arith.divf %278, %279 : vector<16x1xf32>
    %281 = vector.broadcast %280 : vector<16x1xf32> to vector<16x32xf32>
    %282 = arith.subf %274, %281 : vector<16x32xf32>
    %283 = arith.mulf %282, %282 : vector<16x32xf32>
    %cst_79 = arith.constant dense<0.000000e+00> : vector<16xf32>
    %284 = vector.multi_reduction <add>, %283, %cst_79 [1] : vector<16x32xf32> to vector<16xf32>
    %285 = vector.shape_cast %284 : vector<16xf32> to vector<16x1xf32>
    %cst_80 = arith.constant 3.200000e+01 : f32
    %286 = vector.broadcast %cst_80 : f32 to vector<16x1xf32>
    %287 = arith.divf %285, %286 : vector<16x1xf32>
    %288 = vector.broadcast %280 : vector<16x1xf32> to vector<16x32xf32>
    %289 = arith.subf %274, %288 : vector<16x32xf32>
    %cst_81 = arith.constant 9.99999974E-6 : f32
    %290 = vector.broadcast %cst_81 : f32 to vector<16x1xf32>
    %291 = arith.addf %287, %290 : vector<16x1xf32>
    %292 = math.rsqrt %291 : vector<16x1xf32>
    %293 = vector.broadcast %292 : vector<16x1xf32> to vector<16x32xf32>
    %294 = arith.mulf %289, %293 : vector<16x32xf32>
    %295 = vector.broadcast %275 : vector<1x32xf32> to vector<16x32xf32>
    %296 = arith.mulf %294, %295 : vector<16x32xf32>
    %297 = vector.broadcast %276 : vector<1x32xf32> to vector<16x32xf32>
    %298 = arith.addf %296, %297 : vector<16x32xf32>
    %c1_82 = arith.constant 1 : index
    %c0_83 = arith.constant 0 : index
    %c0_84 = arith.constant 0 : index
    %299 = vector.load %arg5[%c1_82, %c0_83, %c0_84] : memref<2x32x128xbf16, #tpu.memory_space<vmem>>, vector<1x32x128xbf16>
    %300 = vector.shape_cast %299 : vector<1x32x128xbf16> to vector<32x128xbf16>
    %301 = arith.truncf %298 : vector<16x32xf32> to vector<16x32xbf16>
    %cst_85 = arith.constant dense<0.000000e+00> : vector<16x128xf32>
    %302 = tpu.matmul %301, %300, %cst_85 {dimension_numbers = #tpu.dot_dimension_numbers<[1], [0], [0], [1], [0, 0, 1, 1], [], []>} : vector<16x32xbf16>, vector<32x128xbf16>, vector<16x128xf32> -> vector<16x128xf32>
    %c27 = arith.constant 27 : index
    %c0_86 = arith.constant 0 : index
    %303 = vector.load %arg1[%c27, %c0_86] : memref<32x128xf32, #tpu.memory_space<vmem>>, vector<1x128xf32>
    %304 = vector.broadcast %303 : vector<1x128xf32> to vector<16x128xf32>
    %305 = arith.addf %302, %304 : vector<16x128xf32>
    %cst_87 = arith.constant 1.702000e+00 : f32
    %306 = vector.broadcast %cst_87 : f32 to vector<16x128xf32>
    %307 = arith.mulf %306, %305 : vector<16x128xf32>
    %308 = arith.negf %307 : vector<16x128xf32>
    %309 = math.exp %308 : vector<16x128xf32>
    %cst_88 = arith.constant 1.000000e+00 : f32
    %310 = vector.broadcast %cst_88 : f32 to vector<16x128xf32>
    %311 = arith.addf %310, %309 : vector<16x128xf32>
    %312 = arith.divf %310, %311 : vector<16x128xf32>
    %313 = arith.mulf %305, %312 : vector<16x128xf32>
    %c1_89 = arith.constant 1 : index
    %c0_90 = arith.constant 0 : index
    %c0_91 = arith.constant 0 : index
    %314 = vector.load %arg6[%c1_89, %c0_90, %c0_91] : memref<2x128x32xbf16, #tpu.memory_space<vmem>>, vector<1x128x32xbf16>
    %315 = vector.shape_cast %314 : vector<1x128x32xbf16> to vector<128x32xbf16>
    %316 = arith.truncf %313 : vector<16x128xf32> to vector<16x128xbf16>
    %cst_92 = arith.constant dense<0.000000e+00> : vector<16x32xf32>
    %317 = tpu.matmul %316, %315, %cst_92 {dimension_numbers = #tpu.dot_dimension_numbers<[1], [0], [0], [1], [0, 0, 1, 1], [], []>} : vector<16x128xbf16>, vector<128x32xbf16>, vector<16x32xf32> -> vector<16x32xf32>
    %318 = arith.addf %274, %317 : vector<16x32xf32>
    %c25 = arith.constant 25 : index
    %c0_93 = arith.constant 0 : index
    %319 = vector.load %arg1[%c25, %c0_93] : memref<32x128xf32, #tpu.memory_space<vmem>>, vector<1x32xf32>
    %320 = vector.broadcast %319 : vector<1x32xf32> to vector<16x32xf32>
    %321 = arith.addf %318, %320 : vector<16x32xf32>
    %322 = vector.extract_strided_slice %321 {offsets = [0, 0], sizes = [1, 32], strides = [1, 1]} : vector<16x32xf32> to vector<1x32xf32>
    %323 = vector.extract_strided_slice %321 {offsets = [8, 0], sizes = [1, 32], strides = [1, 1]} : vector<16x32xf32> to vector<1x32xf32>
    %324 = tpu.concatenate %322, %323 in 0 : vector<1x32xf32>, vector<1x32xf32> -> vector<2x32xf32>
    %c2 = arith.constant 2 : index
    %c0_94 = arith.constant 0 : index
    %325 = vector.load %arg1[%c2, %c0_94] : memref<32x128xf32, #tpu.memory_space<vmem>>, vector<1x32xf32>
    %c3 = arith.constant 3 : index
    %c0_95 = arith.constant 0 : index
    %326 = vector.load %arg1[%c3, %c0_95] : memref<32x128xf32, #tpu.memory_space<vmem>>, vector<1x32xf32>
    %cst_96 = arith.constant dense<0.000000e+00> : vector<2xf32>
    %327 = vector.multi_reduction <add>, %324, %cst_96 [1] : vector<2x32xf32> to vector<2xf32>
    %328 = vector.shape_cast %327 : vector<2xf32> to vector<2x1xf32>
    %cst_97 = arith.constant 3.200000e+01 : f32
    %329 = vector.broadcast %cst_97 : f32 to vector<2x1xf32>
    %330 = arith.divf %328, %329 : vector<2x1xf32>
    %331 = vector.broadcast %330 : vector<2x1xf32> to vector<2x32xf32>
    %332 = arith.subf %324, %331 : vector<2x32xf32>
    %333 = arith.mulf %332, %332 : vector<2x32xf32>
    %cst_98 = arith.constant dense<0.000000e+00> : vector<2xf32>
    %334 = vector.multi_reduction <add>, %333, %cst_98 [1] : vector<2x32xf32> to vector<2xf32>
    %335 = vector.shape_cast %334 : vector<2xf32> to vector<2x1xf32>
    %cst_99 = arith.constant 3.200000e+01 : f32
    %336 = vector.broadcast %cst_99 : f32 to vector<2x1xf32>
    %337 = arith.divf %335, %336 : vector<2x1xf32>
    %338 = vector.broadcast %330 : vector<2x1xf32> to vector<2x32xf32>
    %339 = arith.subf %324, %338 : vector<2x32xf32>
    %cst_100 = arith.constant 9.99999974E-6 : f32
    %340 = vector.broadcast %cst_100 : f32 to vector<2x1xf32>
    %341 = arith.addf %337, %340 : vector<2x1xf32>
    %342 = math.rsqrt %341 : vector<2x1xf32>
    %343 = vector.broadcast %342 : vector<2x1xf32> to vector<2x32xf32>
    %344 = arith.mulf %339, %343 : vector<2x32xf32>
    %345 = vector.broadcast %325 : vector<1x32xf32> to vector<2x32xf32>
    %346 = arith.mulf %344, %345 : vector<2x32xf32>
    %347 = vector.broadcast %326 : vector<1x32xf32> to vector<2x32xf32>
    %348 = arith.addf %346, %347 : vector<2x32xf32>
    %c0_101 = arith.constant 0 : index
    %c0_102 = arith.constant 0 : index
    %349 = vector.load %arg7[%c0_101, %c0_102] : memref<32x16xbf16, #tpu.memory_space<vmem>>, vector<32x16xbf16>
    %350 = arith.truncf %348 : vector<2x32xf32> to vector<2x32xbf16>
    %cst_103 = arith.constant dense<0.000000e+00> : vector<2x16xf32>
    %351 = tpu.matmul %350, %349, %cst_103 {dimension_numbers = #tpu.dot_dimension_numbers<[1], [0], [0], [1], [0, 0, 1, 1], [], []>} : vector<2x32xbf16>, vector<32x16xbf16>, vector<2x16xf32> -> vector<2x16xf32>
    %352 = arith.mulf %351, %351 : vector<2x16xf32>
    %cst_104 = arith.constant dense<0.000000e+00> : vector<2xf32>
    %353 = vector.multi_reduction <add>, %352, %cst_104 [1] : vector<2x16xf32> to vector<2xf32>
    %354 = vector.shape_cast %353 : vector<2xf32> to vector<2x1xf32>
    %cst_105 = arith.constant 1.000000e-24 : f32
    %355 = vector.broadcast %cst_105 : f32 to vector<2x1xf32>
    %356 = arith.maximumf %354, %355 : vector<2x1xf32>
    %357 = math.rsqrt %356 : vector<2x1xf32>
    %358 = vector.broadcast %357 : vector<2x1xf32> to vector<2x16xf32>
    %359 = arith.mulf %351, %358 : vector<2x16xf32>
    %c0_106 = arith.constant 0 : index
    %c0_107 = arith.constant 0 : index
    %360 = vector.load %arg8[%c0_106, %c0_107] : memref<2x16xf32, #tpu.memory_space<vmem>>, vector<2x16xf32>
    tpu.vector_store %arg8[%c0_106, %c0_107], %359 {strides = array<i32>} : memref<2x16xf32, #tpu.memory_space<vmem>>, vector<2x16xf32>,
    return
  }
}

</mosaic_0001>

<bundles_post_ra>
// kernel: model_to_use_xbm_forward.1
= control target key start
LH: loop header
LB: loop body
LE: loop exit
PB: predicated region body
PF: predicated region fallthrough
CT: control target
= control target key end

     0   :  { %s2381_s0 = inlined_call_operand.vmem [shape: bf16[16,192], index: 0, kind: input, shape index: {}]   ;;  %s2382_s1 = inlined_call_operand.vmem [shape: f32[32,128], index: 1, kind: input, shape index: {}]   ;;  %s2383_s2 = inlined_call_operand.vmem [shape: bf16[192,32], index: 2, kind: input, shape index: {}]   ;;  %s2384_s3 = inlined_call_operand.vmem [shape: bf16[2,32,96], index: 3, kind: input, shape index: {}]   ;;  %s2385_s4 = inlined_call_operand.vmem [shape: bf16[2,32,32], index: 4, kind: input, shape index: {}]   ;;  %s2386_s5 = inlined_call_operand.vmem [shape: bf16[2,32,128], index: 5, kind: input, shape index: {}]   ;;  %s2387_s6 = inlined_call_operand.vmem [shape: bf16[2,128,32], index: 6, kind: input, shape index: {}]   ;;  %s2388_s7 = inlined_call_operand.vmem [shape: bf16[32,16], index: 7, kind: input, shape index: {}]   ;;  %s2389_s8 = inlined_call_operand.hbm [shape: f32[2,16], index: 8, kind: output, shape index: {}]  }
   0x1   :  { %v1756_v0 = vld [vmem:[%s2383_s2 + $0x38] sm:$0xff]  ;;  %v1755_v2 = vld [vmem:[%s2383_s2 + $0x30] sm:$0xff]  ;;  %v1754_v4 = vld [vmem:[%s2383_s2 + $0x28] sm:$0xff] }
   0x2   :  { %v1760_v1 = vld [vmem:[%s2383_s2 + $0x58] sm:$0xff]  ;;  %143 = vmatpush.bf16.msra.mxu0 %v1756_v0  ;;  %v1759_v3 = vld [vmem:[%s2383_s2 + $0x50] sm:$0xff]  ;;  %v1758_v5 = vld [vmem:[%s2383_s2 + $0x48] sm:$0xff] }
   0x3   :  { %161 = vmatpush.bf16.msra.mxu1 %v1760_v1  ;;  %v1753_v6 = vld [vmem:[%s2383_s2 + $0x20] sm:$0xff]  ;;  %v1519_v9 = vld [vmem:[%s2381_s0 + $0x8] sm:$0xf0] }
   0x4   :  { %v1757_v7 = vld [vmem:[%s2383_s2 + $0x40] sm:$0xff] }
   0x5   :  { %v1747_v8 = vld [vmem:[%s2381_s0 + $0x4] sm:$0xf] }
   0x6   :  { %144 = vmatpush.bf16.msra.mxu0 %v1755_v2 }
   0x7   :  { %162 = vmatpush.bf16.msra.mxu1 %v1759_v3 }
   0xa   :  { %145 = vmatpush.bf16.msra.mxu0 %v1754_v4 }
   0xb   :  { %163 = vmatpush.bf16.msra.mxu1 %v1758_v5 }
   0xc   :  { %13 = vsyncpa [#allocation3], 0  ;;  %v1752_v10 = vld [vmem:[%s2383_s2 + $0x18] sm:$0xff]  ;;  %v1522_v11 = vor.u32 %v1747_v8, %v1519_v9  ;;  %vm139_vm0 = vcmask 523264   ;;  %v1751_v12 = vld [vmem:[%s2383_s2 + $0x10] sm:$0xff]  ;;  %vm175_vm1 = vcmask 261120  }
   0xd   :  { %v1750_v13 = vld [vmem:[%s2383_s2 + $0x8] sm:$0xff]  ;;  %v1749_v14 = vld [vmem:[%s2383_s2] sm:$0xff]  ;;  %v1928_v29 = vmov 32.0   ;;  %s1929_s29 = smov 112   ;;  %s1930_s30 = smov 96   ;;  %vm337_vm15 = vcmask 130048  }
   0xe   :  { %146 = vmatpush.bf16.msra.mxu0 %v1753_v6  ;;  %v1517_v15 = vld [vmem:[%s2381_s0] sm:$0xf]  ;;  %v1748_v16 = vld [vmem:[%s2381_s0 + $0x4] sm:$0xf0]  ;;  %1828 = vrcp.f32 %v1928_v29  ;;  %s1932_s9 = smov 64   ;;  %s1933_s12 = smov 16  }
   0xf   :  { %164 = vmatpush.bf16.msra.mxu1 %v1757_v7  ;;  %v1518_v17 = vor.u32 %v1748_v16, %v1517_v15  ;;  %v31_v20 = vld [vmem:[%s2382_s1 + $0x4] sm:$0xff]  ;;  %v1808_v60 = vld [vmem:[%s2382_s1] ss:$0 sm:$0xff]  ;;  %v1809_v0 = vld [vmem:[%s2382_s1 + $0x1] ss:$0 sm:$0xff]  ;;  %s1506_s22 = sshll.u32 %s2389_s8, 4  ;;  %s1507_s22 = int_to_ptr.hbm [resolvable:$true] %s1506_s22 }
  0x12   :  { %147 = vmatpush.bf16.msra.mxu0 %v1752_v10  ;;  %1571 = vmatmul.msk.bf16.vlgmr.msra.gmra.mxu1 %vm139_vm0, %v1522_v11 }
  0x14   :  { %v1829_v30 = vpop.eup %1828 }
  0x15   :  { %v183_v31 = vmul.f32 32.0, %v1829_v30  ;;  %vm187_vm2 = vweird.f32 %v1829_v30 }
  0x16   :  { %148 = vmatpush.bf16.msra.mxu0 %v1751_v12 }
  0x17   :  { %v184_v32 = vsub.f32 1.0, %v183_v31 }
  0x19   :  { %v185_v33 = vmul.f32 %v1829_v30, %v184_v32 }
  0x1a   :  { %149 = vmatpush.bf16.msra.mxu0 %v1750_v13 }
  0x1b   :  { %v186_v34 = vadd.f32 %v1829_v30, %v185_v33 }
  0x1d   :  { %v2033_v35 = vsel %vm187_vm2, %v1829_v30, %v186_v34  ;;  %vm426_vm2 = vcmask 64512  }
  0x1e   :  { %150 = vmatpush.bf16.msra.mxu0 %v1749_v14 }
  0x21   :  { %151 = vmatmul.bf16.vlgmr.msra.gmra.mxu0 %v1518_v17 }
  0x8f   :  { %v166_v18 = vpop.f32.mrf.mxu1 }
  0x97   :  { %v168_v24 = vpop.f32.mrf.mxu1 }
  0x9e   :  { %v152_v19 = vpop.f32.mrf.mxu0 }
  0x9f   :  { %v167_v21 = vadd.f32 %v166_v18, %v152_v19 }
  0xa1   :  { %v171_v22 = vadd.f32 %v167_v21, %v31_v20 }
  0xa3   :  { %v176_v23 = vsel %vm175_vm1, %v171_v22, 0.0 }
  0xa4   :  { %177 = vadd.xlane.f32.xlu0 %v176_v23 }
  0xa6   :  { %v154_v25 = vpop.f32.mrf.mxu0 }
  0xa7   :  { %v169_v26 = vadd.f32 %v168_v24, %v154_v25  ;;  %v1761_v24 = vld [vmem:[%s2384_s3] sm:$0xff] }
  0xa9   :  { %v172_v27 = vadd.f32 %v169_v26, %v31_v20 }
  0xab   :  { %v179_v28 = vsel %vm175_vm1, %v172_v27, 0.0 }
  0xac   :  { %180 = vadd.xlane.f32.xlu0 %v179_v28 }
 0x117   :  { %v178_v36 = vpop.xlane.xlu0 %177 }
 0x118   :  { %v189_v37 = vmul.f32 %v2033_v35, %v178_v36 }
 0x11a   :  { %v191_v38 = vsub.f32 %v171_v22, %v189_v37  ;;  %v1762_v22 = vld [vmem:[%s2384_s3 + $0x8] sm:$0xff] }
 0x11b   :  { %317 = vmatpush.bf16.msra.mxu2 %v1762_v22 }
 0x11c   :  { %v193_v39 = vmul.f32 %v191_v38, %v191_v38 }
 0x11e   :  { %v195_v40 = vsel %vm175_vm1, %v193_v39, 0.0 }
 0x11f   :  { %196 = vadd.xlane.f32.xlu1 %v195_v40  ;;  %v181_v41 = vpop.xlane.xlu0 %180  ;;  %318 = vmatpush.bf16.msra.mxu2 %v1761_v24 }
 0x120   :  { %v190_v42 = vmul.f32 %v2033_v35, %v181_v41 }
 0x122   :  { %v192_v43 = vsub.f32 %v172_v27, %v190_v42 }
 0x124   :  { %v194_v44 = vmul.f32 %v192_v43, %v192_v43 }
 0x126   :  { %v198_v45 = vsel %vm175_vm1, %v194_v44, 0.0  ;;  %v1810_v44 = vld [vmem:[%s2382_s1 + $0xc] ss:$0 sm:$0xff] }
 0x127   :  { %199 = vadd.xlane.f32.xlu1 %v198_v45 }
 0x192   :  { %v197_v46 = vpop.xlane.xlu1 %196 }
 0x193   :  { %v201_v47 = vmul.f32 %v197_v46, %v2033_v35 }
 0x195   :  { %v203_v48 = vadd.f32 1e-05, %v201_v47 }
 0x197   :  { %1830 = vrsqrt.f32 %v203_v48  ;;  %vm211_vm4 = vweird.f32 %v203_v48 }
 0x19a   :  { %v200_v49 = vpop.xlane.xlu1 %199 }
 0x19b   :  { %v202_v50 = vmul.f32 %v200_v49, %v2033_v35  ;;  %v1811_v49 = vld [vmem:[%s2382_s1 + $0xd] ss:$0 sm:$0xff] }
 0x19d   :  { %v1831_v51 = vpop.eup %1830  ;;  %v204_v52 = vadd.f32 1e-05, %v202_v50 }
 0x19e   :  { %v206_v53 = vmul.f32 %v1831_v51, %v203_v48  ;;  %vm212_vm3 = vweird.f32 %v1831_v51 }
 0x19f   :  { %1832 = vrsqrt.f32 %v204_v52  ;;  %vm213_vm5 = vmor %vm211_vm4, %vm212_vm3  ;;  %vm221_vm7 = vweird.f32 %v204_v52  ;;  %vm480_vm3 = vcmask 1043456  }
 0x1a0   :  { %v207_v54 = vmul.f32 %v1831_v51, %v206_v53 }
 0x1a2   :  { %v208_v55 = vmul.f32 0.5, %v207_v54  ;;  %v1812_v54 = vld [vmem:[%s2382_s1 + $0x12] ss:$0 sm:$0xff] }
 0x1a4   :  { %v209_v56 = vsub.f32 1.5, %v208_v55 }
 0x1a5   :  { %v1833_v57 = vpop.eup %1832 }
 0x1a6   :  { %v210_v58 = vmul.f32 %v1831_v51, %v209_v56  ;;  %v216_v59 = vmul.f32 %v1833_v57, %v204_v52  ;;  %vm222_vm6 = vweird.f32 %v1833_v57 }
 0x1a7   :  { %vm223_vm8 = vmor %vm221_vm7, %vm222_vm6 }
 0x1a8   :  { %v214_v61 = vsel %vm213_vm5, %v1831_v51, %v210_v58  ;;  %v217_v62 = vmul.f32 %v1833_v57, %v216_v59 }
 0x1a9   :  { %v225_v63 = vmul.f32 %v214_v61, %v191_v38 }
 0x1aa   :  { %v218_v1 = vmul.f32 0.5, %v217_v62 }
 0x1ab   :  { %v228_v2 = vmul.f32 %v1808_v60, %v225_v63 }
 0x1ac   :  { %v219_v3 = vsub.f32 1.5, %v218_v1 }
 0x1ad   :  { %v2047_v4 = vadd.f32 %v1809_v0, %v228_v2 }
 0x1ae   :  { %v220_v5 = vmul.f32 %v1833_v57, %v219_v3 }
 0x1af   :  { %v239_v6 = vsel %vm175_vm1, %v2047_v4, 0.0 }
 0x1b0   :  { %v224_v7 = vsel %vm223_vm8, %v1833_v57, %v220_v5  ;;  %240 = vadd.xlane.f32.xlu2 %v239_v6 }
 0x1b1   :  { %v226_v8 = vmul.f32 %v224_v7, %v192_v43 }
 0x1b3   :  { %v229_v9 = vmul.f32 %v1808_v60, %v226_v8 }
 0x1b5   :  { %v2051_v10 = vadd.f32 %v1809_v0, %v229_v9 }
 0x1b7   :  { %v242_v11 = vsel %vm175_vm1, %v2051_v10, 0.0 }
 0x1b8   :  { %243 = vadd.xlane.f32.xlu2 %v242_v11 }
 0x223   :  { %v241_v12 = vpop.xlane.xlu2 %240 }
 0x224   :  { %v245_v13 = vmul.f32 %v241_v12, %v2033_v35 }
 0x226   :  { %v247_v14 = vsub.f32 %v2047_v4, %v245_v13 }
 0x228   :  { %v249_v15 = vmul.f32 %v247_v14, %v247_v14 }
 0x22a   :  { %v251_v16 = vsel %vm175_vm1, %v249_v15, 0.0 }
 0x22b   :  { %252 = vadd.xlane.f32.xlu0 %v251_v16  ;;  %v244_v17 = vpop.xlane.xlu2 %243 }
 0x22c   :  { %v246_v18 = vmul.f32 %v244_v17, %v2033_v35  ;;  %v233_v17 = vlaneseq }
 0x22e   :  { %v248_v19 = vsub.f32 %v2051_v10, %v246_v18  ;;  %v234_v18 = vand.u32 127, %v233_v17 }
 0x230   :  { %v250_v20 = vmul.f32 %v248_v19, %v248_v19  ;;  %vm235_vm0 = vcmp.lt.s32.totalorder %v234_v18, 5 }
 0x232   :  { %v254_v21 = vsel %vm175_vm1, %v250_v20, 0.0 }
 0x233   :  { %255 = vadd.xlane.f32.xlu1 %v254_v21 }
 0x29e   :  { %v253_v23 = vpop.xlane.xlu0 %252 }
 0x29f   :  { %v257_v25 = vmul.f32 %v253_v23, %v2033_v35 }
 0x2a1   :  { %v259_v26 = vadd.f32 1e-05, %v257_v25 }
 0x2a3   :  { %1834 = vrsqrt.f32 %v259_v26  ;;  %vm267_vm10 = vweird.f32 %v259_v26 }
 0x2a6   :  { %v256_v27 = vpop.xlane.xlu1 %255 }
 0x2a7   :  { %v258_v28 = vmul.f32 %v256_v27, %v2033_v35 }
 0x2a9   :  { %v1835_v29 = vpop.eup %1834  ;;  %v260_v30 = vadd.f32 1e-05, %v258_v28 }
 0x2aa   :  { %v262_v31 = vmul.f32 %v1835_v29, %v259_v26  ;;  %vm268_vm9 = vweird.f32 %v1835_v29 }
 0x2ab   :  { %1836 = vrsqrt.f32 %v260_v30  ;;  %vm269_vm11 = vmor %vm267_vm10, %vm268_vm9  ;;  %vm277_vm13 = vweird.f32 %v260_v30 }
 0x2ac   :  { %v263_v32 = vmul.f32 %v1835_v29, %v262_v31 }
 0x2ae   :  { %v264_v33 = vmul.f32 0.5, %v263_v32 }
 0x2b0   :  { %v265_v34 = vsub.f32 1.5, %v264_v33 }
 0x2b1   :  { %v1837_v36 = vpop.eup %1836 }
 0x2b2   :  { %v266_v37 = vmul.f32 %v1835_v29, %v265_v34  ;;  %v272_v38 = vmul.f32 %v1837_v36, %v260_v30  ;;  %vm278_vm12 = vweird.f32 %v1837_v36 }
 0x2b3   :  { %vm279_vm14 = vmor %vm277_vm13, %vm278_vm12 }
 0x2b4   :  { %v273_v39 = vmul.f32 %v1837_v36, %v272_v38  ;;  %v270_v40 = vsel %vm269_vm11, %v1835_v29, %v266_v37 }
 0x2b5   :  { %v281_v43 = vmul.f32 %v270_v40, %v247_v14 }
 0x2b6   :  { %v274_v41 = vmul.f32 0.5, %v273_v39 }
 0x2b7   :  { %v284_v48 = vmul.f32 %v1810_v44, %v281_v43 }
 0x2b8   :  { %v275_v42 = vsub.f32 1.5, %v274_v41 }
 0x2b9   :  { %v287_v51 = vadd.f32 %v1811_v49, %v284_v48 }
 0x2ba   :  { %v276_v45 = vmul.f32 %v1837_v36, %v275_v42 }
 0x2bc   :  { %v280_v46 = vsel %vm279_vm14, %v1837_v36, %v276_v45 }
 0x2bd   :  { %v282_v47 = vmul.f32 %v280_v46, %v248_v19  ;;  %v1931_v19 = vmov -1e+30  }
 0x2be   :  { %v2102_v20 = vsel %vm235_vm0, 0.0, %v1931_v19 }
 0x2bf   :  { %v285_v50 = vmul.f32 %v1810_v44, %v282_v47 }
 0x2c1   :  { %v288_v52 = vadd.f32 %v1811_v49, %v285_v50 }
 0x2c3   :  { %v293_v53 = vpack.c.bf16 %v288_v52, %v287_v51 }
 0x2c5   :  { %1580 = vmatmul.msk.bf16.vlgmr.msra.gmra.mxu2 %vm175_vm1, %v293_v53 }
 0x348   :  { %v320_v55 = vpop.f32.mrf.mxu2 }
 0x349   :  { %v321_v56 = vadd.f32 %v1812_v54, %v320_v55 }
 0x34b   :  { %v325_v57 = vpack.c.bf16 %v321_v56, %v321_v56 }
 0x34d   :  { %328 = vrot.lane.b32.xlu2 %v325_v57, %s1929_s29  ;;  %v333_v58 = vunpack.c.l.b16 %v325_v57 }
 0x34f   :  { %v2080_v59 = vpack.c.b16 %v333_v58, %v333_v58 }
 0x350   :  { %v322_v60 = vpop.f32.mrf.mxu2 }
 0x351   :  { %v323_v61 = vadd.f32 %v1812_v54, %v322_v60  ;;  %335 = vrot.lane.b32.xlu1 %v2080_v59, %s1930_s30 }
 0x353   :  { %v326_v62 = vpack.c.bf16 %v323_v61, %v323_v61 }
 0x355   :  { %331 = vrot.lane.b32.xlu0 %v326_v62, %s1929_s29  ;;  %v380_v63 = vunpack.c.l.b16 %v326_v62 }
 0x357   :  { %v2085_v0 = vpack.c.b16 %v380_v63, %v380_v63 }
 0x359   :  { %382 = vrot.lane.b32.xlu2 %v2085_v0, %s1930_s30 }
 0x3a7   :  { %v329_v1 = vpop.permute.xlu2 %328 }
 0x3a8   :  { %v357_v2 = vunpack.c.l.b16 %v329_v1 }
 0x3aa   :  { %v358_v3 = vpack.c.b16 %v357_v2, %v357_v2 }
 0x3ac   :  { %359 = vrot.lane.b32.xlu0 %v358_v3, %s1930_s30 }
 0x3b3   :  { %v383_v5 = vpop.permute.xlu2 %382 }
 0x3b4   :  { %v388_v8 = vsel %vm337_vm15, %v383_v5, 0 }
 0x3c3   :  { %v336_v6 = vpop.permute.xlu1 %335 }
 0x3c4   :  { %v342_v7 = vsel %vm337_vm15, %v336_v6, 0 }
 0x3c5   :  { %351 = vmatpush.bf16.xpose.msra.mxu3 %v342_v7 }
 0x3c7   :  { %v332_v9 = vpop.permute.xlu0 %331 }
 0x3c8   :  { %v403_v11 = vunpack.c.l.b16 %v332_v9 }
 0x3ca   :  { %v2092_v12 = vpack.c.b16 %v403_v11, %v403_v11 }
 0x3cc   :  { %405 = vrot.lane.b32.xlu2 %v2092_v12, %s1930_s30  ;;  %1581 = vmatmul.msk.bf16.vlgmr.msra.gmra.mxu3 %vm337_vm15, %v325_v57 }
 0x3cd   :  { %397 = vmatpush.bf16.xpose.msrb.mxu3 %v388_v8 }
 0x3dc   :  { %1583 = vmatmul.msk.bf16.vlgmr.msrb.gmra.mxu3 %vm337_vm15, %v326_v62 }
 0x41e   :  { %v360_v13 = vpop.permute.xlu0 %359 }
 0x41f   :  { %v365_v14 = vsel %vm337_vm15, %v360_v13, 0 }
 0x420   :  { %374 = vmatpush.bf16.xpose.msrb.mxu2 %v365_v14 }
 0x426   :  { %v406_v15 = vpop.permute.xlu2 %405 }
 0x427   :  { %v411_v16 = vsel %vm337_vm15, %v406_v15, 0  ;;  %1582 = vmatmul.msk.bf16.vlgmr.msrb.gmra.mxu2 %vm337_vm15, %v329_v1 }
 0x428   :  { %420 = vmatpush.bf16.xpose.msra.mxu3 %v411_v16 }
 0x42f   :  { %1584 = vmatmul.msk.bf16.vlgmr.msra.gmra.mxu3 %vm337_vm15, %v332_v9 }
 0x44f   :  { %v353_v21 = vpop.f32.mrf.mxu3 }
 0x450   :  { %v354_v22 = vadd.f32 %v353_v21, %v2102_v20  ;;  %v1764_v21 = vld [vmem:[%s2385_s4 + $0x8] sm:$0xff] }
 0x452   :  { %v427_v23 = vsel %vm426_vm2, %v354_v22, -inf }
 0x453   :  { %428 = vmax.xlane.f32.xlu2 %v427_v23 }
 0x457   :  { %v355_v24 = vpop.f32.mrf.mxu3 }
 0x45f   :  { %v399_v25 = vpop.f32.mrf.mxu3 }
 0x460   :  { %v400_v30 = vadd.f32 %v399_v25, %v2102_v20 }
 0x462   :  { %v433_v36 = vsel %vm426_vm2, %v400_v30, -inf }
 0x467   :  { %v401_v26 = vpop.f32.mrf.mxu3 }
 0x4aa   :  { %v376_v27 = vpop.f32.mrf.mxu2 }
 0x4ab   :  { %v377_v28 = vadd.f32 %v376_v27, %v2102_v20 }
 0x4ad   :  { %v430_v29 = vsel %vm426_vm2, %v377_v28, -inf }
 0x4ae   :  { %431 = vmax.xlane.f32.xlu1 %v430_v29 }
 0x4b2   :  { %v378_v31 = vpop.f32.mrf.mxu2  ;;  %v422_v32 = vpop.f32.mrf.mxu3 }
 0x4b3   :  { %v423_v33 = vadd.f32 %v422_v32, %v2102_v20  ;;  %v1763_v31 = vld [vmem:[%s2385_s4] sm:$0xff] }
 0x4b5   :  { %v436_v34 = vsel %vm426_vm2, %v423_v33, -inf }
 0x4b6   :  { %437 = vmax.xlane.f32.xlu0 %v436_v34  ;;  %434 = vmax.xlane.f32.xlu1 %v433_v36 }
 0x4ba   :  { %v424_v37 = vpop.f32.mrf.mxu3 }
 0x4c6   :  { %v429_v38 = vpop.xlane.xlu2 %428 }
 0x4c7   :  { %v439_v39 = vsub.f32 %v354_v22, %v429_v38 }
 0x4c9   :  { %v443_v40 = vmul.f32 1.442695, %v439_v39  ;;  %v1813_v39 = vld [vmem:[%s2382_s1 + $0xe] ss:$0 sm:$0xff] }
 0x4cb   :  { %1838 = vpow2.f32 %v443_v40 }
 0x4cf   :  { %497 = vrot.lane.b32.xlu1 %v358_v3, %s1932_s9 }
 0x4d1   :  { %v1839_v41 = vpop.eup %1838 }
 0x4d2   :  { %v451_v42 = vsel %vm426_vm2, %v1839_v41, 0.0 }
 0x4d3   :  { %452 = vadd.xlane.f32.xlu2 %v451_v42 }
 0x521   :  { %v432_v43 = vpop.xlane.xlu1 %431 }
 0x522   :  { %v440_v44 = vsub.f32 %v377_v28, %v432_v43 }
 0x524   :  { %v445_v45 = vmul.f32 1.442695, %v440_v44 }
 0x526   :  { %1840 = vpow2.f32 %v445_v45 }
 0x529   :  { %v435_v46 = vpop.xlane.xlu1 %434  ;;  %v438_v47 = vpop.xlane.xlu0 %437 }
 0x52a   :  { %v441_v48 = vsub.f32 %v400_v30, %v435_v46  ;;  %v442_v51 = vsub.f32 %v423_v33, %v438_v47 }
 0x52c   :  { %v1841_v49 = vpop.eup %1840  ;;  %v447_v50 = vmul.f32 1.442695, %v441_v48  ;;  %v449_v53 = vmul.f32 1.442695, %v442_v51 }
 0x52d   :  { %v454_v52 = vsel %vm426_vm2, %v1841_v49, 0.0 }
 0x52e   :  { %455 = vadd.xlane.f32.xlu0 %v454_v52  ;;  %1842 = vpow2.f32 %v447_v50 }
 0x52f   :  { %1844 = vpow2.f32 %v449_v53 }
 0x534   :  { %v1843_v54 = vpop.eup %1842 }
 0x535   :  { %v457_v55 = vsel %vm426_vm2, %v1843_v54, 0.0  ;;  %v1845_v56 = vpop.eup %1844 }
 0x536   :  { %458 = vadd.xlane.f32.xlu2 %v457_v55  ;;  %v460_v57 = vsel %vm426_vm2, %v1845_v56, 0.0 }
 0x53e   :  { %461 = vadd.xlane.f32.xlu2 %v460_v57 }
 0x541   :  { %v498_v58 = vpop.permute.xlu1 %497 }
 0x542   :  { %v503_v60 = vsel %vm480_vm3, %v498_v58, 0  ;;  %539 = vrot.lane.b32.xlu0 %v2092_v12, %s1932_s9 }
 0x543   :  { %512 = vmatpush.bf16.msrb.mxu3 %v503_v60  ;;  %v1765_v60 = vld [vmem:[%s2386_s5] sm:$0xff] }
 0x546   :  { %v453_v62 = vpop.xlane.xlu2 %452 }
 0x54a   :  { %518 = vrot.lane.b32.xlu0 %v2085_v0, %s1932_s9 }
 0x556   :  { %475 = vrot.lane.b32.xlu2 %v2080_v59, %s1932_s9 }
 0x5a1   :  { %v456_v61 = vpop.xlane.xlu0 %455 }
 0x5a2   :  { %1846 = vrcp.f32 %v456_v61 }
 0x5a3   :  { %1848 = vrcp.f32 %v453_v62 }
 0x5a8   :  { %v1847_v63 = vpop.eup %1846 }
 0x5a9   :  { %v468_v1 = vmul.f32 %v1847_v63, %v1841_v49  ;;  %v459_v2 = vpop.xlane.xlu2 %458  ;;  %v1849_v0 = vpop.eup %1848 }
 0x5aa   :  { %1850 = vrcp.f32 %v459_v2  ;;  %v467_v9 = vmul.f32 %v1849_v0, %v1839_v41 }
 0x5ab   :  { %v472_v3 = vpack.c.bf16 %v468_v1, %v468_v1 }
 0x5ac   :  { %v471_v17 = vpack.c.bf16 %v467_v9, %v467_v9 }
 0x5ad   :  { %1586 = vmatmul.msk.bf16.vlgmr.msrb.gmra.mxu3 %vm426_vm2, %v472_v3 }
 0x5b0   :  { %v1851_v8 = vpop.eup %1850 }
 0x5b1   :  { %v462_v5 = vpop.xlane.xlu2 %461  ;;  %v469_v13 = vmul.f32 %v1851_v8, %v1843_v54 }
 0x5b2   :  { %1852 = vrcp.f32 %v462_v5 }
 0x5b3   :  { %v473_v19 = vpack.c.bf16 %v469_v13, %v469_v13 }
 0x5b4   :  { %v540_v6 = vpop.permute.xlu0 %539 }
 0x5b5   :  { %v545_v7 = vsel %vm480_vm3, %v540_v6, 0 }
 0x5b6   :  { %554 = vmatpush.bf16.msrb.mxu1 %v545_v7 }
 0x5b8   :  { %v1853_v59 = vpop.eup %1852 }
 0x5b9   :  { %v470_v11 = vmul.f32 %v1853_v59, %v1845_v56  ;;  %v476_v12 = vpop.permute.xlu2 %475  ;;  %v1766_v56 = vld [vmem:[%s2386_s5 + $0x8] sm:$0xff] }
 0x5ba   :  { %v482_v14 = vsel %vm480_vm3, %v476_v12, 0  ;;  %690 = vmatpush.bf16.msra.mxu3 %v1766_v56 }
 0x5bb   :  { %491 = vmatpush.bf16.msra.mxu2 %v482_v14  ;;  %v474_v16 = vpack.c.bf16 %v470_v11, %v470_v11  ;;  %v1814_v14 = vld [vmem:[%s2382_s1 + $0xf] ss:$0 sm:$0xff] }
 0x5bc   :  { %v519_v15 = vpop.permute.xlu0 %518 }
 0x5bd   :  { %v524_v18 = vsel %vm480_vm3, %v519_v15, 0  ;;  %1588 = vmatmul.msk.bf16.vlgmr.msrb.gmra.mxu1 %vm426_vm2, %v474_v16 }
 0x5be   :  { %533 = vmatpush.bf16.msrb.mxu0 %v524_v18  ;;  %1585 = vmatmul.msk.bf16.vlgmr.msra.gmra.mxu2 %vm426_vm2, %v471_v17  ;;  %v1815_v18 = vld [vmem:[%s2382_s1 + $0x10] ss:$0 sm:$0xff] }
 0x5bf   :  { %596 = vmatpush.bf16.msrb.mxu2 %v1764_v21  ;;  %691 = vmatpush.bf16.msra.mxu3 %v1765_v60 }
 0x5c1   :  { %1587 = vmatmul.msk.bf16.vlgmr.msrb.gmra.mxu0 %vm426_vm2, %v473_v19 }
 0x5c3   :  { %597 = vmatpush.bf16.msrb.mxu2 %v1763_v31  ;;  %v1816_v31 = vld [vmem:[%s2382_s1 + $0x13] ss:$0 sm:$0xff] }
 0x630   :  { %v514_v22 = vpop.f32.mrf.mxu3 }
 0x638   :  { %v516_v23 = vpop.f32.mrf.mxu3 }
 0x63a   :  { %v556_v24 = vpop.f32.mrf.mxu1 }
 0x63b   :  { %v1798_v25 = vpack.i.bf16 %v556_v24, %v514_v22 }
 0x63d   :  { %1799 = vrot.lane.b32.xlu1 %v1798_v25, %s1933_s12 }
 0x63e   :  { %v535_v26 = vpop.f32.mrf.mxu0 }
 0x641   :  { %v493_v27 = vpop.f32.mrf.mxu2 }
 0x642   :  { %v558_v28 = vpop.f32.mrf.mxu1 }
 0x643   :  { %v1772_v28 = vld [vmem:[%s2387_s6 + $0x28] sm:$0xff] }
 0x646   :  { %v537_v29 = vpop.f32.mrf.mxu0 }
 0x647   :  { %v1771_v29 = vld [vmem:[%s2387_s6 + $0x20] sm:$0xff] }
 0x649   :  { %v495_v30 = vpop.f32.mrf.mxu2 }
 0x64a   :  { %v1770_v30 = vld [vmem:[%s2387_s6 + $0x18] sm:$0xff] }
 0x6af   :  { %v1800_v32 = vpop.permute.xlu1 %1799 }
 0x6b0   :  { %v1802_v33 = vunpack.i.h.bf16 %v1800_v32  ;;  %v1801_v34 = vunpack.i.l.bf16 %v1800_v32 }
 0x6b2   :  { %v569_v36 = vsel %vm337_vm15, %v535_v26, %v1802_v33  ;;  %v564_v37 = vsel %vm337_vm15, %v493_v27, %v1801_v34  ;;  %v1774_v26 = vld [vmem:[%s2387_s6 + $0x38] sm:$0xff]  ;;  %v1773_v27 = vld [vmem:[%s2387_s6 + $0x30] sm:$0xff] }
 0x6b3   :  { %v574_v38 = vpack.c.bf16 %v569_v36, %v564_v37  ;;  %805 = vmatpush.bf16.msra.mxu0 %v1774_v26  ;;  %v1769_v33 = vld [vmem:[%s2387_s6 + $0x10] sm:$0xff]  ;;  %v1768_v37 = vld [vmem:[%s2387_s6 + $0x8] sm:$0xff] }
 0x6b5   :  { %1597 = vmatmul.msk.bf16.vlgmr.msrb.gmra.mxu2 %vm175_vm1, %v574_v38 }
 0x6b7   :  { %806 = vmatpush.bf16.msra.mxu0 %v1773_v27  ;;  %v1776_v27 = vld [vmem:[%s2384_s3 + $0x18] sm:$0xff] }
 0x6b8   :  { %906 = vmatpush.bf16.msra.mxu1 %v1776_v27 }
 0x6bb   :  { %807 = vmatpush.bf16.msra.mxu0 %v1772_v28 }
 0x6bf   :  { %808 = vmatpush.bf16.msra.mxu0 %v1771_v29 }
 0x6c3   :  { %809 = vmatpush.bf16.msra.mxu0 %v1770_v30  ;;  %v1775_v30 = vld [vmem:[%s2384_s3 + $0x10] sm:$0xff] }
 0x6c4   :  { %907 = vmatpush.bf16.msra.mxu1 %v1775_v30 }
 0x6c7   :  { %810 = vmatpush.bf16.msra.mxu0 %v1769_v33 }
 0x6cb   :  { %811 = vmatpush.bf16.msra.mxu0 %v1768_v37 }
 0x738   :  { %v599_v40 = vpop.f32.mrf.mxu2 }
 0x739   :  { %v604_v41 = vadd.f32 %v599_v40, %v2047_v4  ;;  %v1767_v40 = vld [vmem:[%s2387_s6] sm:$0xff] }
 0x73a   :  { %812 = vmatpush.bf16.msra.mxu0 %v1767_v40 }
 0x73b   :  { %v2145_v42 = vadd.f32 %v1813_v39, %v604_v41 }
 0x73d   :  { %v612_v43 = vsel %vm175_vm1, %v2145_v42, 0.0 }
 0x73e   :  { %613 = vadd.xlane.f32.xlu0 %v612_v43 }
 0x740   :  { %v601_v44 = vpop.f32.mrf.mxu2 }
 0x741   :  { %v605_v45 = vadd.f32 %v601_v44, %v2051_v10 }
 0x743   :  { %v2150_v46 = vadd.f32 %v1813_v39, %v605_v45 }
 0x745   :  { %v615_v47 = vsel %vm175_vm1, %v2150_v46, 0.0 }
 0x746   :  { %616 = vadd.xlane.f32.xlu1 %v615_v47 }
 0x7b1   :  { %v614_v48 = vpop.xlane.xlu0 %613 }
 0x7b2   :  { %v618_v49 = vmul.f32 %v614_v48, %v2033_v35 }
 0x7b4   :  { %v620_v4 = vsub.f32 %v2145_v42, %v618_v49 }
 0x7b6   :  { %v622_v50 = vmul.f32 %v620_v4, %v620_v4 }
 0x7b8   :  { %v624_v51 = vsel %vm175_vm1, %v622_v50, 0.0 }
 0x7b9   :  { %625 = vadd.xlane.f32.xlu2 %v624_v51  ;;  %v617_v52 = vpop.xlane.xlu1 %616 }
 0x7ba   :  { %v619_v53 = vmul.f32 %v617_v52, %v2033_v35 }
 0x7bc   :  { %v621_v10 = vsub.f32 %v2150_v46, %v619_v53 }
 0x7be   :  { %v623_v54 = vmul.f32 %v621_v10, %v621_v10 }
 0x7c0   :  { %v627_v55 = vsel %vm175_vm1, %v623_v54, 0.0 }
 0x7c1   :  { %628 = vadd.xlane.f32.xlu0 %v627_v55 }
 0x82c   :  { %v626_v57 = vpop.xlane.xlu2 %625 }
 0x82d   :  { %v630_v58 = vmul.f32 %v626_v57, %v2033_v35 }
 0x82f   :  { %v632_v61 = vadd.f32 1e-05, %v630_v58 }
 0x831   :  { %1854 = vrsqrt.f32 %v632_v61  ;;  %vm640_vm5 = vweird.f32 %v632_v61 }
 0x834   :  { %v629_v62 = vpop.xlane.xlu0 %628 }
 0x835   :  { %v631_v63 = vmul.f32 %v629_v62, %v2033_v35 }
 0x837   :  { %v1855_v1 = vpop.eup %1854  ;;  %v633_v2 = vadd.f32 1e-05, %v631_v63 }
 0x838   :  { %v635_v3 = vmul.f32 %v1855_v1, %v632_v61  ;;  %vm641_vm4 = vweird.f32 %v1855_v1 }
 0x839   :  { %1856 = vrsqrt.f32 %v633_v2  ;;  %vm642_vm6 = vmor %vm640_vm5, %vm641_vm4  ;;  %vm650_vm8 = vweird.f32 %v633_v2 }
 0x83a   :  { %v636_v5 = vmul.f32 %v1855_v1, %v635_v3 }
 0x83c   :  { %v637_v6 = vmul.f32 0.5, %v636_v5 }
 0x83e   :  { %v638_v7 = vsub.f32 1.5, %v637_v6 }
 0x83f   :  { %v1857_v0 = vpop.eup %1856 }
 0x840   :  { %v639_v8 = vmul.f32 %v1855_v1, %v638_v7  ;;  %v645_v59 = vmul.f32 %v1857_v0, %v633_v2  ;;  %vm651_vm7 = vweird.f32 %v1857_v0 }
 0x841   :  { %vm652_vm9 = vmor %vm650_vm8, %vm651_vm7 }
 0x842   :  { %v646_v9 = vmul.f32 %v1857_v0, %v645_v59  ;;  %v643_v11 = vsel %vm642_vm6, %v1855_v1, %v639_v8  ;;  %v1817_v59 = vld [vmem:[%s2382_s1 + $0x11] ss:$0 sm:$0xff] }
 0x843   :  { %v654_v15 = vmul.f32 %v643_v11, %v620_v4 }
 0x844   :  { %v647_v12 = vmul.f32 0.5, %v646_v9 }
 0x845   :  { %v657_v19 = vmul.f32 %v1814_v14, %v654_v15 }
 0x846   :  { %v648_v13 = vsub.f32 1.5, %v647_v12 }
 0x847   :  { %v660_v23 = vadd.f32 %v1815_v18, %v657_v19 }
 0x848   :  { %v649_v16 = vmul.f32 %v1857_v0, %v648_v13 }
 0x84a   :  { %v653_v17 = vsel %vm652_vm9, %v1857_v0, %v649_v16 }
 0x84b   :  { %v655_v21 = vmul.f32 %v653_v17, %v621_v10 }
 0x84d   :  { %v658_v22 = vmul.f32 %v1814_v14, %v655_v21 }
 0x84f   :  { %v661_v24 = vadd.f32 %v1815_v18, %v658_v22 }
 0x851   :  { %v666_v25 = vpack.c.bf16 %v661_v24, %v660_v23 }
 0x853   :  { %1606 = vmatmul.msk.bf16.vlgmr.msra.gmra.mxu3 %vm175_vm1, %v666_v25 }
 0x8d6   :  { %v693_v32 = vpop.f32.mrf.mxu3 }
 0x8d7   :  { %v694_v34 = vadd.f32 %v1816_v31, %v693_v32 }
 0x8d9   :  { %v1607_v36 = vmul.f32 -1.702, %v694_v34 }
 0x8db   :  { %v702_v38 = vmul.f32 1.442695, %v1607_v36 }
 0x8dd   :  { %1858 = vpow2.f32 %v702_v38 }
 0x8de   :  { %v695_v39 = vpop.f32.mrf.mxu3 }
 0x8df   :  { %v696_v41 = vadd.f32 %v1816_v31, %v695_v39 }
 0x8e1   :  { %v1608_v43 = vmul.f32 -1.702, %v696_v41 }
 0x8e3   :  { %v1859_v44 = vpop.eup %1858  ;;  %v704_v45 = vmul.f32 1.442695, %v1608_v43 }
 0x8e4   :  { %v706_v47 = vadd.f32 1.0, %v1859_v44 }
 0x8e5   :  { %1860 = vpow2.f32 %v704_v45 }
 0x8e6   :  { %1862 = vrcp.f32 %v706_v47  ;;  %v719_v55 = vand.u32 2147483648, %v706_v47  ;;  %vm713_vm11 = vweird.f32 %v706_v47  ;;  %v717_v56 = vand.u32 2147483647, %v706_v47 }
 0x8e8   :  { %v720_v63 = vor.u32 1.1754944e-38, %v719_v55  ;;  %vm718_vm14 = vcmp.eq.f32.partialorder %v717_v56, 8.507059e+37 }
 0x8eb   :  { %v1861_v48 = vpop.eup %1860 }
 0x8ec   :  { %v1863_v49 = vpop.eup %1862  ;;  %v707_v4 = vadd.f32 1.0, %v1861_v48 }
 0x8ed   :  { %v709_v50 = vmul.f32 %v1863_v49, %v706_v47  ;;  %vm714_vm10 = vweird.f32 %v1863_v49 }
 0x8ee   :  { %1864 = vrcp.f32 %v707_v4  ;;  %vm715_vm12 = vmor %vm713_vm11, %vm714_vm10  ;;  %v734_v58 = vand.u32 2147483648, %v707_v4  ;;  %v732_v62 = vand.u32 2147483647, %v707_v4  ;;  %vm728_vm0 = vweird.f32 %v707_v4 }
 0x8ef   :  { %v710_v51 = vsub.f32 1.0, %v709_v50 }
 0x8f0   :  { %v735_v3 = vor.u32 1.1754944e-38, %v734_v58  ;;  %vm733_vm5 = vcmp.eq.f32.partialorder %v732_v62, 8.507059e+37 }
 0x8f1   :  { %v711_v52 = vmul.f32 %v1863_v49, %v710_v51 }
 0x8f3   :  { %v712_v10 = vadd.f32 %v1863_v49, %v711_v52 }
 0x8f4   :  { %v1865_v53 = vpop.eup %1864 }
 0x8f5   :  { %v724_v54 = vmul.f32 %v1865_v53, %v707_v4  ;;  %v716_v60 = vsel %vm715_vm12, %v1863_v49, %v712_v10  ;;  %vm729_vm13 = vweird.f32 %v1865_v53  ;;  %v1818_v4 = vld [vmem:[%s2382_s1 + $0x14] ss:$0 sm:$0xff] }
 0x8f6   :  { %v721_v2 = vsel %vm718_vm14, %v720_v63, %v716_v60  ;;  %vm730_vm4 = vmor %vm728_vm0, %vm729_vm13  ;;  %v1820_v60 = vld [vmem:[%s2382_s1 + $0x1a] ss:$0 sm:$0xff] }
 0x8f7   :  { %v725_v57 = vsub.f32 1.0, %v724_v54  ;;  %v738_v7 = vmul.f32 %v721_v2, %v694_v34 }
 0x8f9   :  { %v726_v61 = vmul.f32 %v1865_v53, %v725_v57 }
 0x8fb   :  { %v727_v1 = vadd.f32 %v1865_v53, %v726_v61 }
 0x8fd   :  { %v731_v5 = vsel %vm730_vm4, %v1865_v53, %v727_v1  ;;  %v1819_v53 = vld [vmem:[%s2382_s1 + $0x15] ss:$0 sm:$0xff] }
 0x8fe   :  { %v736_v6 = vsel %vm733_vm5, %v735_v3, %v731_v5 }
 0x8ff   :  { %v739_v0 = vmul.f32 %v736_v6, %v696_v41 }
 0x901   :  { %v756_v8 = vpack.c.bf16 %v739_v0, %v738_v7 }
 0x903   :  { %813 = vmatmul.bf16.vlgmr.msra.gmra.mxu0 %v756_v8 }
 0x980   :  { %v814_v9 = vpop.f32.mrf.mxu0 }
 0x981   :  { %v819_v11 = vadd.f32 %v814_v9, %v2145_v42 }
 0x983   :  { %v2206_v12 = vadd.f32 %v1817_v59, %v819_v11 }
 0x985   :  { %v827_v13 = vsel %vm175_vm1, %v2206_v12, 0.0 }
 0x986   :  { %828 = vadd.xlane.f32.xlu1 %v827_v13 }
 0x988   :  { %v816_v14 = vpop.f32.mrf.mxu0 }
 0x989   :  { %v820_v15 = vadd.f32 %v816_v14, %v2150_v46 }
 0x98b   :  { %v2211_v16 = vadd.f32 %v1817_v59, %v820_v15 }
 0x98d   :  { %v830_v17 = vsel %vm175_vm1, %v2211_v16, 0.0 }
 0x98e   :  { %831 = vadd.xlane.f32.xlu0 %v830_v17 }
 0x9f9   :  { %v829_v18 = vpop.xlane.xlu1 %828 }
 0x9fa   :  { %v833_v19 = vmul.f32 %v829_v18, %v2033_v35 }
 0x9fc   :  { %v835_v42 = vsub.f32 %v2206_v12, %v833_v19 }
 0x9fe   :  { %v837_v21 = vmul.f32 %v835_v42, %v835_v42 }
 0xa00   :  { %v839_v22 = vsel %vm175_vm1, %v837_v21, 0.0 }
 0xa01   :  { %840 = vadd.xlane.f32.xlu1 %v839_v22  ;;  %v832_v23 = vpop.xlane.xlu0 %831 }
 0xa02   :  { %v834_v24 = vmul.f32 %v832_v23, %v2033_v35 }
 0xa04   :  { %v836_v46 = vsub.f32 %v2211_v16, %v834_v24 }
 0xa06   :  { %v838_v25 = vmul.f32 %v836_v46, %v836_v46 }
 0xa08   :  { %v842_v26 = vsel %vm175_vm1, %v838_v25, 0.0 }
 0xa09   :  { %843 = vadd.xlane.f32.xlu2 %v842_v26 }
 0xa74   :  { %v841_v28 = vpop.xlane.xlu1 %840 }
 0xa75   :  { %v845_v29 = vmul.f32 %v841_v28, %v2033_v35 }
 0xa77   :  { %v847_v31 = vadd.f32 1e-05, %v845_v29 }
 0xa79   :  { %1866 = vrsqrt.f32 %v847_v31  ;;  %vm855_vm7 = vweird.f32 %v847_v31 }
 0xa7c   :  { %v844_v32 = vpop.xlane.xlu2 %843 }
 0xa7d   :  { %v846_v33 = vmul.f32 %v844_v32, %v2033_v35 }
 0xa7f   :  { %v1867_v34 = vpop.eup %1866  ;;  %v848_v36 = vadd.f32 1e-05, %v846_v33 }
 0xa80   :  { %v850_v37 = vmul.f32 %v1867_v34, %v847_v31  ;;  %vm856_vm6 = vweird.f32 %v1867_v34 }
 0xa81   :  { %1868 = vrsqrt.f32 %v848_v36  ;;  %vm857_vm8 = vmor %vm855_vm7, %vm856_vm6  ;;  %vm865_vm10 = vweird.f32 %v848_v36 }
 0xa82   :  { %v851_v38 = vmul.f32 %v1867_v34, %v850_v37 }
 0xa84   :  { %v852_v39 = vmul.f32 0.5, %v851_v38 }
 0xa86   :  { %v853_v40 = vsub.f32 1.5, %v852_v39 }
 0xa87   :  { %v1869_v41 = vpop.eup %1868 }
 0xa88   :  { %v854_v43 = vmul.f32 %v1867_v34, %v853_v40  ;;  %v860_v44 = vmul.f32 %v1869_v41, %v848_v36  ;;  %vm866_vm9 = vweird.f32 %v1869_v41 }
 0xa89   :  { %vm867_vm11 = vmor %vm865_vm10, %vm866_vm9 }
 0xa8a   :  { %v861_v45 = vmul.f32 %v1869_v41, %v860_v44  ;;  %v858_v47 = vsel %vm857_vm8, %v1867_v34, %v854_v43 }
 0xa8b   :  { %v869_v50 = vmul.f32 %v858_v47, %v835_v42 }
 0xa8c   :  { %v862_v48 = vmul.f32 0.5, %v861_v45 }
 0xa8d   :  { %v872_v10 = vmul.f32 %v1818_v4, %v869_v50 }
 0xa8e   :  { %v863_v49 = vsub.f32 1.5, %v862_v48 }
 0xa8f   :  { %v875_v56 = vadd.f32 %v1819_v53, %v872_v10 }
 0xa90   :  { %v864_v51 = vmul.f32 %v1869_v41, %v863_v49 }
 0xa92   :  { %v868_v52 = vsel %vm867_vm11, %v1869_v41, %v864_v51  ;;  %vm1417_vm11 = vcmask 1040384  }
 0xa93   :  { %v870_v54 = vmul.f32 %v868_v52, %v836_v46 }
 0xa95   :  { %v873_v55 = vmul.f32 %v1818_v4, %v870_v54 }
 0xa97   :  { %v876_v57 = vadd.f32 %v1819_v53, %v873_v55 }
 0xa99   :  { %v882_v58 = vpack.c.bf16 %v876_v57, %v875_v56 }
 0xa9b   :  { %1653 = vmatmul.msk.bf16.vlgmr.msra.gmra.mxu1 %vm175_vm1, %v882_v58 }
 0xb18   :  { %v909_v61 = vpop.f32.mrf.mxu1 }
 0xb19   :  { %v910_v62 = vadd.f32 %v1820_v60, %v909_v61 }
 0xb1b   :  { %v914_v63 = vpack.c.bf16 %v910_v62, %v910_v62 }
 0xb1d   :  { %917 = vrot.lane.b32.xlu1 %v914_v63, %s1929_s29  ;;  %v922_v1 = vunpack.c.l.b16 %v914_v63 }
 0xb1f   :  { %v2240_v2 = vpack.c.b16 %v922_v1, %v922_v1 }
 0xb20   :  { %v911_v3 = vpop.f32.mrf.mxu1 }
 0xb21   :  { %v912_v5 = vadd.f32 %v1820_v60, %v911_v3  ;;  %924 = vrot.lane.b32.xlu2 %v2240_v2, %s1930_s30 }
 0xb23   :  { %v915_v6 = vpack.c.bf16 %v912_v5, %v912_v5 }
 0xb25   :  { %920 = vrot.lane.b32.xlu0 %v915_v6, %s1929_s29  ;;  %v968_v15 = vunpack.c.l.b16 %v915_v6 }
 0xb27   :  { %v969_v17 = vpack.c.b16 %v968_v15, %v968_v15 }
 0xb7b   :  { %v925_v7 = vpop.permute.xlu2 %924 }
 0xb7c   :  { %v930_v0 = vsel %vm337_vm15, %v925_v7, 0 }
 0xb7d   :  { %939 = vmatpush.bf16.xpose.msra.mxu2 %v930_v0 }
 0xb84   :  { %1654 = vmatmul.msk.bf16.vlgmr.msra.gmra.mxu2 %vm337_vm15, %v914_v63 }
 0xb8f   :  { %v918_v8 = vpop.permute.xlu1 %917 }
 0xb90   :  { %v945_v59 = vunpack.c.l.b16 %v918_v8 }
 0xb92   :  { %v2247_v9 = vpack.c.b16 %v945_v59, %v945_v59 }
 0xb94   :  { %947 = vrot.lane.b32.xlu1 %v2247_v9, %s1930_s30 }
 0xb97   :  { %v921_v11 = vpop.permute.xlu0 %920 }
 0xb98   :  { %v991_v13 = vunpack.c.l.b16 %v921_v11 }
 0xb9a   :  { %v992_v14 = vpack.c.b16 %v991_v13, %v991_v13 }
 0xb9c   :  { %993 = vrot.lane.b32.xlu0 %v992_v14, %s1930_s30 }
 0xba4   :  { %970 = vrot.lane.b32.xlu0 %v969_v17, %s1930_s30 }
 0xc06   :  { %v948_v18 = vpop.permute.xlu1 %947 }
 0xc07   :  { %v953_v19 = vsel %vm337_vm15, %v948_v18, 0  ;;  %v941_v42 = vpop.f32.mrf.mxu2 }
 0xc08   :  { %v942_v21 = vadd.f32 %v941_v42, %v2102_v20  ;;  %962 = vmatpush.bf16.xpose.msrb.mxu3 %v953_v19 }
 0xc0a   :  { %v1014_v22 = vsel %vm426_vm2, %v942_v21, -inf }
 0xc0b   :  { %1015 = vmax.xlane.f32.xlu0 %v1014_v22 }
 0xc0e   :  { %v994_v23 = vpop.permute.xlu0 %993 }
 0xc0f   :  { %v999_v24 = vsel %vm337_vm15, %v994_v23, 0  ;;  %v943_v46 = vpop.f32.mrf.mxu2  ;;  %1655 = vmatmul.msk.bf16.vlgmr.msrb.gmra.mxu3 %vm337_vm15, %v918_v8  ;;  %v1778_v23 = vld [vmem:[%s2385_s4 + $0x18] sm:$0xff] }
 0xc10   :  { %1008 = vmatpush.bf16.xpose.msrb.mxu2 %v999_v24 }
 0xc16   :  { %v971_v25 = vpop.permute.xlu0 %970 }
 0xc17   :  { %v976_v26 = vsel %vm337_vm15, %v971_v25, 0  ;;  %1657 = vmatmul.msk.bf16.vlgmr.msrb.gmra.mxu2 %vm337_vm15, %v921_v11 }
 0xc18   :  { %985 = vmatpush.bf16.xpose.msrb.mxu1 %v976_v26 }
 0xc1f   :  { %1656 = vmatmul.msk.bf16.vlgmr.msrb.gmra.mxu1 %vm337_vm15, %v915_v6 }
 0xc7e   :  { %v1016_v40 = vpop.xlane.xlu0 %1015 }
 0xc7f   :  { %v1026_v44 = vsub.f32 %v942_v21, %v1016_v40  ;;  %v1821_v40 = vld [vmem:[%s2382_s1 + $0x16] ss:$0 sm:$0xff] }
 0xc81   :  { %v1030_v47 = vmul.f32 1.442695, %v1026_v44 }
 0xc92   :  { %v964_v27 = vpop.f32.mrf.mxu3 }
 0xc93   :  { %v965_v28 = vadd.f32 %v964_v27, %v2102_v20 }
 0xc95   :  { %v1017_v29 = vsel %vm426_vm2, %v965_v28, -inf }
 0xc96   :  { %1018 = vmax.xlane.f32.xlu1 %v1017_v29 }
 0xc9a   :  { %v966_v30 = vpop.f32.mrf.mxu3  ;;  %v1010_v31 = vpop.f32.mrf.mxu2 }
 0xc9b   :  { %v1011_v32 = vadd.f32 %v1010_v31, %v2102_v20 }
 0xc9c   :  { %v987_v33 = vpop.f32.mrf.mxu1 }
 0xc9d   :  { %v1023_v34 = vsel %vm426_vm2, %v1011_v32, -inf  ;;  %v988_v36 = vadd.f32 %v987_v33, %v2102_v20 }
 0xc9e   :  { %1024 = vmax.xlane.f32.xlu2 %v1023_v34 }
 0xc9f   :  { %v1020_v39 = vsel %vm426_vm2, %v988_v36, -inf }
 0xca2   :  { %v1012_v37 = vpop.f32.mrf.mxu2 }
 0xca4   :  { %v989_v38 = vpop.f32.mrf.mxu1 }
 0xca6   :  { %1021 = vmax.xlane.f32.xlu2 %v1020_v39 }
 0xcbe   :  { %1125 = vrot.lane.b32.xlu2 %v992_v14, %s1932_s9 }
 0xcc6   :  { %1104 = vrot.lane.b32.xlu2 %v969_v17, %s1932_s9 }
 0xd09   :  { %v1019_v41 = vpop.xlane.xlu1 %1018 }
 0xd0a   :  { %v1027_v43 = vsub.f32 %v965_v28, %v1019_v41 }
 0xd0c   :  { %v1032_v45 = vmul.f32 1.442695, %v1027_v43 }
 0xd0e   :  { %1870 = vpow2.f32 %v1032_v45 }
 0xd0f   :  { %1872 = vpow2.f32 %v1030_v47 }
 0xd11   :  { %v1025_v48 = vpop.xlane.xlu2 %1024 }
 0xd12   :  { %v1029_v49 = vsub.f32 %v1011_v32, %v1025_v48  ;;  %v1777_v32 = vld [vmem:[%s2385_s4 + $0x10] sm:$0xff] }
 0xd14   :  { %v1871_v4 = vpop.eup %1870  ;;  %v1036_v20 = vmul.f32 1.442695, %v1029_v49 }
 0xd15   :  { %v1041_v50 = vsel %vm426_vm2, %v1871_v4, 0.0  ;;  %v1873_v52 = vpop.eup %1872 }
 0xd16   :  { %1874 = vpow2.f32 %v1036_v20  ;;  %1042 = vadd.xlane.f32.xlu0 %v1041_v50  ;;  %v1038_v56 = vsel %vm426_vm2, %v1873_v52, 0.0 }
 0xd19   :  { %v1022_v51 = vpop.xlane.xlu2 %1021 }
 0xd1a   :  { %v1028_v53 = vsub.f32 %v988_v36, %v1022_v51 }
 0xd1c   :  { %v1875_v10 = vpop.eup %1874  ;;  %v1034_v54 = vmul.f32 1.442695, %v1028_v53 }
 0xd1d   :  { %v1047_v55 = vsel %vm426_vm2, %v1875_v10, 0.0 }
 0xd1e   :  { %1876 = vpow2.f32 %v1034_v54  ;;  %1048 = vadd.xlane.f32.xlu1 %v1047_v55  ;;  %1039 = vadd.xlane.f32.xlu0 %v1038_v56  ;;  %v1780_v56 = vld [vmem:[%s2386_s5 + $0x18] sm:$0xff] }
 0xd21   :  { %v1126_v57 = vpop.permute.xlu2 %1125 }
 0xd22   :  { %v1131_v58 = vsel %vm480_vm3, %v1126_v57, 0 }
 0xd23   :  { %1140 = vmatpush.bf16.msra.mxu2 %v1131_v58 }
 0xd24   :  { %v1877_v60 = vpop.eup %1876 }
 0xd25   :  { %v1044_v61 = vsel %vm426_vm2, %v1877_v60, 0.0 }
 0xd26   :  { %1045 = vadd.xlane.f32.xlu0 %v1044_v61  ;;  %v1779_v61 = vld [vmem:[%s2386_s5 + $0x10] sm:$0xff] }
 0xd29   :  { %v1105_v62 = vpop.permute.xlu2 %1104 }
 0xd2a   :  { %v1110_v63 = vsel %vm480_vm3, %v1105_v62, 0 }
 0xd2b   :  { %1119 = vmatpush.bf16.msra.mxu1 %v1110_v63 }
 0xd37   :  { %1083 = vrot.lane.b32.xlu1 %v2247_v9, %s1932_s9 }
 0xd3a   :  { %1062 = vrot.lane.b32.xlu0 %v2240_v2, %s1932_s9 }
 0xd89   :  { %v1043_v1 = vpop.xlane.xlu0 %1042 }
 0xd91   :  { %v1049_v3 = vpop.xlane.xlu1 %1048  ;;  %v1040_v5 = vpop.xlane.xlu0 %1039 }
 0xd92   :  { %1878 = vrcp.f32 %v1049_v3 }
 0xd98   :  { %v1879_v6 = vpop.eup %1878 }
 0xd99   :  { %v1057_v7 = vmul.f32 %v1879_v6, %v1875_v10  ;;  %v1046_v0 = vpop.xlane.xlu0 %1045 }
 0xd9a   :  { %1880 = vrcp.f32 %v1046_v0 }
 0xd9b   :  { %v1061_v8 = vpack.c.bf16 %v1057_v7, %v1057_v7  ;;  %1882 = vrcp.f32 %v1043_v1 }
 0xd9c   :  { %1884 = vrcp.f32 %v1040_v5 }
 0xd9d   :  { %1661 = vmatmul.msk.bf16.vlgmr.msra.gmra.mxu2 %vm426_vm2, %v1061_v8 }
 0xda0   :  { %v1881_v59 = vpop.eup %1880 }
 0xda1   :  { %v1056_v11 = vmul.f32 %v1881_v59, %v1877_v60  ;;  %v1883_v9 = vpop.eup %1882 }
 0xda2   :  { %v1885_v2 = vpop.eup %1884  ;;  %v1055_v14 = vmul.f32 %v1883_v9, %v1871_v4 }
 0xda3   :  { %v1060_v13 = vpack.c.bf16 %v1056_v11, %v1056_v11  ;;  %v1054_v18 = vmul.f32 %v1885_v2, %v1873_v52 }
 0xda4   :  { %v1059_v19 = vpack.c.bf16 %v1055_v14, %v1055_v14 }
 0xda5   :  { %1660 = vmatmul.msk.bf16.vlgmr.msra.gmra.mxu1 %vm426_vm2, %v1060_v13  ;;  %v1058_v22 = vpack.c.bf16 %v1054_v18, %v1054_v18 }
 0xda9   :  { %v1084_v15 = vpop.permute.xlu1 %1083 }
 0xdaa   :  { %v1089_v17 = vsel %vm480_vm3, %v1084_v15, 0  ;;  %v1822_v15 = vld [vmem:[%s2382_s1 + $0x17] ss:$0 sm:$0xff] }
 0xdab   :  { %1098 = vmatpush.bf16.msrb.mxu0 %v1089_v17 }
 0xdac   :  { %v1063_v42 = vpop.permute.xlu0 %1062 }
 0xdad   :  { %v1068_v21 = vsel %vm480_vm3, %v1063_v42, 0  ;;  %v1823_v42 = vld [vmem:[%s2382_s1 + $0x18] ss:$0 sm:$0xff] }
 0xdae   :  { %1077 = vmatpush.bf16.msra.mxu3 %v1068_v21  ;;  %1659 = vmatmul.msk.bf16.vlgmr.msrb.gmra.mxu0 %vm426_vm2, %v1059_v19 }
 0xdaf   :  { %1278 = vmatpush.bf16.msra.mxu0 %v1780_v56 }
 0xdb1   :  { %1658 = vmatmul.msk.bf16.vlgmr.msra.gmra.mxu3 %vm426_vm2, %v1058_v22 }
 0xdb2   :  { %1183 = vmatpush.bf16.msrb.mxu3 %v1778_v23 }
 0xdb3   :  { %1279 = vmatpush.bf16.msra.mxu0 %v1779_v61 }
 0xdb6   :  { %1184 = vmatpush.bf16.msrb.mxu3 %v1777_v32 }
 0xe20   :  { %v1142_v24 = vpop.f32.mrf.mxu2 }
 0xe22   :  { %v1121_v46 = vpop.f32.mrf.mxu1 }
 0xe28   :  { %v1144_v25 = vpop.f32.mrf.mxu2 }
 0xe2a   :  { %v1123_v26 = vpop.f32.mrf.mxu1 }
 0xe2b   :  { %v1100_v27 = vpop.f32.mrf.mxu0  ;;  %v1788_v26 = vld [vmem:[%s2387_s6 + $0x78] sm:$0xff] }
 0xe2c   :  { %v1803_v28 = vpack.i.bf16 %v1142_v24, %v1100_v27  ;;  %1394 = vmatpush.bf16.msrb.mxu1 %v1788_v26  ;;  %v1787_v27 = vld [vmem:[%s2387_s6 + $0x70] sm:$0xff] }
 0xe2e   :  { %1804 = vrot.lane.b32.xlu1 %v1803_v28, %s1933_s12  ;;  %v1786_v28 = vld [vmem:[%s2387_s6 + $0x68] sm:$0xff] }
 0xe30   :  { %1395 = vmatpush.bf16.msrb.mxu1 %v1787_v27 }
 0xe33   :  { %v1102_v29 = vpop.f32.mrf.mxu0 }
 0xe34   :  { %v1079_v30 = vpop.f32.mrf.mxu3  ;;  %1396 = vmatpush.bf16.msrb.mxu1 %v1786_v28  ;;  %v1785_v29 = vld [vmem:[%s2387_s6 + $0x60] sm:$0xff] }
 0xe38   :  { %1397 = vmatpush.bf16.msrb.mxu1 %v1785_v29 }
 0xe3c   :  { %v1081_v31 = vpop.f32.mrf.mxu3 }
 0xe3d   :  { %v1784_v31 = vld [vmem:[%s2387_s6 + $0x58] sm:$0xff] }
 0xe3e   :  { %1398 = vmatpush.bf16.msrb.mxu1 %v1784_v31 }
 0xea0   :  { %v1805_v33 = vpop.permute.xlu1 %1804 }
 0xea1   :  { %v1807_v34 = vunpack.i.h.bf16 %v1805_v33  ;;  %v1806_v36 = vunpack.i.l.bf16 %v1805_v33 }
 0xea3   :  { %v1150_v37 = vsel %vm337_vm15, %v1079_v30, %v1806_v36  ;;  %v1155_v38 = vsel %vm337_vm15, %v1121_v46, %v1807_v34  ;;  %v1824_v30 = vld [vmem:[%s2382_s1 + $0x1b] ss:$0 sm:$0xff]  ;;  %v1783_v34 = vld [vmem:[%s2387_s6 + $0x50] sm:$0xff] }
 0xea4   :  { %v1161_v39 = vpack.c.bf16 %v1155_v38, %v1150_v37  ;;  %1399 = vmatpush.bf16.msrb.mxu1 %v1783_v34  ;;  %v1782_v38 = vld [vmem:[%s2387_s6 + $0x48] sm:$0xff] }
 0xea6   :  { %1674 = vmatmul.msk.bf16.vlgmr.msrb.gmra.mxu3 %vm175_vm1, %v1161_v39 }
 0xea8   :  { %1400 = vmatpush.bf16.msrb.mxu1 %v1782_v38 }
 0xf29   :  { %v1186_v41 = vpop.f32.mrf.mxu3 }
 0xf2a   :  { %v1191_v43 = vadd.f32 %v1186_v41, %v2206_v12  ;;  %v1781_v41 = vld [vmem:[%s2387_s6 + $0x40] sm:$0xff] }
 0xf2b   :  { %1401 = vmatpush.bf16.msrb.mxu1 %v1781_v41 }
 0xf2c   :  { %v2299_v44 = vadd.f32 %v1821_v40, %v1191_v43 }
 0xf2e   :  { %v1199_v45 = vsel %vm175_vm1, %v2299_v44, 0.0 }
 0xf2f   :  { %1200 = vadd.xlane.f32.xlu2 %v1199_v45 }
 0xf31   :  { %v1188_v47 = vpop.f32.mrf.mxu3 }
 0xf32   :  { %v1192_v48 = vadd.f32 %v1188_v47, %v2211_v16 }
 0xf34   :  { %v2304_v49 = vadd.f32 %v1821_v40, %v1192_v48 }
 0xf36   :  { %v1202_v4 = vsel %vm175_vm1, %v2304_v49, 0.0 }
 0xf37   :  { %1203 = vadd.xlane.f32.xlu1 %v1202_v4 }
 0xfa2   :  { %v1201_v20 = vpop.xlane.xlu2 %1200 }
 0xfa3   :  { %v1205_v50 = vmul.f32 %v1201_v20, %v2033_v35 }
 0xfa5   :  { %v1207_v12 = vsub.f32 %v2299_v44, %v1205_v50 }
 0xfa7   :  { %v1209_v51 = vmul.f32 %v1207_v12, %v1207_v12 }
 0xfa9   :  { %v1211_v52 = vsel %vm175_vm1, %v1209_v51, 0.0 }
 0xfaa   :  { %1212 = vadd.xlane.f32.xlu0 %v1211_v52  ;;  %v1204_v53 = vpop.xlane.xlu1 %1203 }
 0xfab   :  { %v1206_v10 = vmul.f32 %v1204_v53, %v2033_v35 }
 0xfad   :  { %v1208_v16 = vsub.f32 %v2304_v49, %v1206_v10 }
 0xfaf   :  { %v1210_v54 = vmul.f32 %v1208_v16, %v1208_v16 }
 0xfb1   :  { %v1214_v55 = vsel %vm175_vm1, %v1210_v54, 0.0 }
 0xfb2   :  { %1215 = vadd.xlane.f32.xlu2 %v1214_v55 }
0x101d   :  { %v1213_v57 = vpop.xlane.xlu0 %1212 }
0x101e   :  { %v1217_v58 = vmul.f32 %v1213_v57, %v2033_v35 }
0x1020   :  { %v1219_v60 = vadd.f32 1e-05, %v1217_v58 }
0x1022   :  { %1886 = vrsqrt.f32 %v1219_v60  ;;  %vm1227_vm2 = vweird.f32 %v1219_v60 }
0x1025   :  { %v1216_v62 = vpop.xlane.xlu2 %1215 }
0x1026   :  { %v1218_v63 = vmul.f32 %v1216_v62, %v2033_v35 }
0x1028   :  { %v1887_v1 = vpop.eup %1886  ;;  %v1220_v3 = vadd.f32 1e-05, %v1218_v63 }
0x1029   :  { %v1222_v5 = vmul.f32 %v1887_v1, %v1219_v60  ;;  %vm1228_vm15 = vweird.f32 %v1887_v1 }
0x102a   :  { %1888 = vrsqrt.f32 %v1220_v3  ;;  %vm1229_vm3 = vmor %vm1227_vm2, %vm1228_vm15  ;;  %vm1237_vm13 = vweird.f32 %v1220_v3  ;;  %vm1421_vm15 = vcmask 254976  }
0x102b   :  { %v1223_v6 = vmul.f32 %v1887_v1, %v1222_v5 }
0x102d   :  { %v1224_v7 = vmul.f32 0.5, %v1223_v6 }
0x102f   :  { %v1225_v0 = vsub.f32 1.5, %v1224_v7 }
0x1030   :  { %v1889_v8 = vpop.eup %1888 }
0x1031   :  { %v1226_v59 = vmul.f32 %v1887_v1, %v1225_v0  ;;  %v1232_v11 = vmul.f32 %v1889_v8, %v1220_v3  ;;  %vm1238_vm12 = vweird.f32 %v1889_v8 }
0x1032   :  { %vm1239_vm14 = vmor %vm1237_vm13, %vm1238_vm12  ;;  %vm1482_vm13 = vcmask 123904  }
0x1033   :  { %v1233_v13 = vmul.f32 %v1889_v8, %v1232_v11  ;;  %v1230_v9 = vsel %vm1229_vm3, %v1887_v1, %v1226_v59 }
0x1034   :  { %v1241_v17 = vmul.f32 %v1230_v9, %v1207_v12  ;;  %v1825_v9 = vld [vmem:[%s2382_s1 + $0x19] ss:$0 sm:$0xff] }
0x1035   :  { %v1234_v2 = vmul.f32 0.5, %v1233_v13 }
0x1036   :  { %v1244_v21 = vmul.f32 %v1822_v15, %v1241_v17 }
0x1037   :  { %v1235_v14 = vsub.f32 1.5, %v1234_v2 }
0x1038   :  { %v1247_v24 = vadd.f32 %v1823_v42, %v1244_v21 }
0x1039   :  { %v1236_v18 = vmul.f32 %v1889_v8, %v1235_v14 }
0x103b   :  { %v1240_v19 = vsel %vm1239_vm14, %v1889_v8, %v1236_v18 }
0x103c   :  { %v1242_v22 = vmul.f32 %v1240_v19, %v1208_v16 }
0x103e   :  { %v1245_v23 = vmul.f32 %v1822_v15, %v1242_v22 }
0x1040   :  { %v1248_v46 = vadd.f32 %v1823_v42, %v1245_v23 }
0x1042   :  { %v1254_v25 = vpack.c.bf16 %v1248_v46, %v1247_v24  ;;  %v1790_v24 = vld [vmem:[%s2388_s7 + $0x8] sm:$0xff] }
0x1043   :  { %1474 = vmatpush.bf16.msrb.mxu2 %v1790_v24 }
0x1044   :  { %1687 = vmatmul.msk.bf16.vlgmr.msra.gmra.mxu0 %vm175_vm1, %v1254_v25 }
0x10c1   :  { %v1281_v32 = vpop.f32.mrf.mxu0 }
0x10c2   :  { %v1282_v33 = vadd.f32 %v1824_v30, %v1281_v32 }
0x10c4   :  { %v1688_v36 = vmul.f32 -1.702, %v1282_v33 }
0x10c6   :  { %v1290_v37 = vmul.f32 1.442695, %v1688_v36 }
0x10c8   :  { %1890 = vpow2.f32 %v1290_v37 }
0x10c9   :  { %v1283_v39 = vpop.f32.mrf.mxu0 }
0x10ca   :  { %v1284_v40 = vadd.f32 %v1824_v30, %v1283_v39 }
0x10cc   :  { %v1689_v43 = vmul.f32 -1.702, %v1284_v40 }
0x10ce   :  { %v1891_v45 = vpop.eup %1890  ;;  %v1292_v47 = vmul.f32 1.442695, %v1689_v43 }
0x10cf   :  { %v1294_v48 = vadd.f32 1.0, %v1891_v45 }
0x10d0   :  { %1892 = vpow2.f32 %v1292_v47 }
0x10d1   :  { %1894 = vrcp.f32 %v1294_v48  ;;  %v1307_v54 = vand.u32 2147483648, %v1294_v48  ;;  %vm1301_vm4 = vweird.f32 %v1294_v48  ;;  %v1305_v55 = vand.u32 2147483647, %v1294_v48 }
0x10d3   :  { %v1308_v62 = vor.u32 1.1754944e-38, %v1307_v54  ;;  %vm1306_vm7 = vcmp.eq.f32.partialorder %v1305_v55, 8.507059e+37 }
0x10d6   :  { %v1893_v4 = vpop.eup %1892 }
0x10d7   :  { %v1895_v20 = vpop.eup %1894  ;;  %v1295_v50 = vadd.f32 1.0, %v1893_v4 }
0x10d8   :  { %v1297_v12 = vmul.f32 %v1895_v20, %v1294_v48  ;;  %vm1302_vm0 = vweird.f32 %v1895_v20 }
0x10d9   :  { %1896 = vrcp.f32 %v1295_v50  ;;  %vm1303_vm5 = vmor %vm1301_vm4, %vm1302_vm0  ;;  %v1322_v57 = vand.u32 2147483648, %v1295_v50  ;;  %v1320_v61 = vand.u32 2147483647, %v1295_v50  ;;  %vm1316_vm8 = vweird.f32 %v1295_v50 }
0x10da   :  { %v1298_v51 = vsub.f32 1.0, %v1297_v12 }
0x10db   :  { %v1323_v3 = vor.u32 1.1754944e-38, %v1322_v57  ;;  %vm1321_vm10 = vcmp.eq.f32.partialorder %v1320_v61, 8.507059e+37 }
0x10dc   :  { %v1299_v52 = vmul.f32 %v1895_v20, %v1298_v51 }
0x10de   :  { %v1300_v10 = vadd.f32 %v1895_v20, %v1299_v52 }
0x10df   :  { %v1897_v53 = vpop.eup %1896 }
0x10e0   :  { %v1312_v16 = vmul.f32 %v1897_v53, %v1295_v50  ;;  %v1304_v58 = vsel %vm1303_vm5, %v1895_v20, %v1300_v10  ;;  %vm1317_vm6 = vweird.f32 %v1897_v53 }
0x10e1   :  { %v1309_v1 = vsel %vm1306_vm7, %v1308_v62, %v1304_v58  ;;  %vm1318_vm9 = vmor %vm1316_vm8, %vm1317_vm6 }
0x10e2   :  { %v1313_v56 = vsub.f32 1.0, %v1312_v16  ;;  %v1326_v7 = vmul.f32 %v1309_v1, %v1282_v33  ;;  %v1826_v33 = vld [vmem:[%s2382_s1 + $0x2] ss:$0 sm:$0xff] }
0x10e4   :  { %v1314_v60 = vmul.f32 %v1897_v53, %v1313_v56 }
0x10e6   :  { %v1315_v63 = vadd.f32 %v1897_v53, %v1314_v60 }
0x10e8   :  { %v1319_v5 = vsel %vm1318_vm9, %v1897_v53, %v1315_v63 }
0x10e9   :  { %v1324_v6 = vsel %vm1321_vm10, %v1323_v3, %v1319_v5 }
0x10ea   :  { %v1327_v0 = vmul.f32 %v1324_v6, %v1284_v40 }
0x10ec   :  { %v1345_v8 = vpack.c.bf16 %v1327_v0, %v1326_v7 }
0x10ee   :  { %1402 = vmatmul.bf16.vlgmr.msrb.gmra.mxu1 %v1345_v8 }
0x116b   :  { %v1403_v59 = vpop.f32.mrf.mxu1 }
0x116c   :  { %v1408_v13 = vadd.f32 %v1403_v59, %v2299_v44 }
0x116e   :  { %v1412_v15 = vadd.f32 %v1825_v9, %v1408_v13 }
0x1173   :  { %v1405_v11 = vpop.f32.mrf.mxu1 }
0x1174   :  { %v1409_v2 = vadd.f32 %v1405_v11, %v2304_v49  ;;  %v1789_v49 = vld [vmem:[%s2388_s7] sm:$0xff] }
0x1175   :  { %1475 = vmatpush.bf16.msrb.mxu2 %v1789_v49 }
0x1176   :  { %v1413_v14 = vadd.f32 %v1825_v9, %v1409_v2 }
0x1178   :  { %v1415_v17 = vrot.slane %v1413_v14, 7 }
0x117a   :  { %v1418_v18 = vsel %vm1417_vm11, %v1412_v15, %v1415_v17 }
0x117b   :  { %v1422_v19 = vsel %vm1421_vm15, %v1418_v18, 0.0 }
0x117c   :  { %1423 = vadd.xlane.f32.xlu1 %v1422_v19 }
0x11ef   :  { %v1424_v42 = vpop.xlane.xlu1 %1423 }
0x11f0   :  { %v1425_v21 = vmul.f32 %v1424_v42, %v2033_v35 }
0x11f2   :  { %v1426_v22 = vsub.f32 %v1418_v18, %v1425_v21 }
0x11f4   :  { %v1427_v23 = vmul.f32 %v1426_v22, %v1426_v22 }
0x11f6   :  { %v1428_v44 = vsel %vm1421_vm15, %v1427_v23, 0.0 }
0x11f7   :  { %1429 = vadd.xlane.f32.xlu2 %v1428_v44 }
0x126a   :  { %v1430_v46 = vpop.xlane.xlu2 %1429 }
0x126b   :  { %v1431_v25 = vmul.f32 %v1430_v46, %v2033_v35  ;;  %v1827_v35 = vld [vmem:[%s2382_s1 + $0x3] ss:$0 sm:$0xff]  ;;  %s1934_s1 = smov [#allocation2]  }
0x126c   :  { %s1504_s19 = sshll.u32 %s1934_s1, 4  ;;  %s1505_s19 = int_to_ptr.vmem [resolvable:$true] %s1504_s19 }
0x126d   :  { %v1432_v26 = vadd.f32 1e-05, %v1431_v25 }
0x126f   :  { %1898 = vrsqrt.f32 %v1432_v26  ;;  %vm1439_vm3 = vweird.f32 %v1432_v26 }
0x1275   :  { %v1899_v27 = vpop.eup %1898 }
0x1276   :  { %v1434_v28 = vmul.f32 %v1899_v27, %v1432_v26  ;;  %vm1440_vm2 = vweird.f32 %v1899_v27 }
0x1277   :  { %vm1441_vm12 = vmor %vm1439_vm3, %vm1440_vm2 }
0x1278   :  { %v1435_v29 = vmul.f32 %v1899_v27, %v1434_v28 }
0x127a   :  { %v1436_v30 = vmul.f32 0.5, %v1435_v29 }
0x127c   :  { %v1437_v31 = vsub.f32 1.5, %v1436_v30 }
0x127e   :  { %v1438_v32 = vmul.f32 %v1899_v27, %v1437_v31 }
0x1280   :  { %v1442_v34 = vsel %vm1441_vm12, %v1899_v27, %v1438_v32 }
0x1281   :  { %v1443_v36 = vmul.f32 %v1442_v34, %v1426_v22 }
0x1283   :  { %v1445_v37 = vmul.f32 %v1826_v33, %v1443_v36 }
0x1285   :  { %v1447_v38 = vadd.f32 %v1827_v35, %v1445_v37 }
0x1287   :  { %v1452_v39 = vpack.c.bf16 %v1447_v38, %v1447_v38 }
0x1289   :  { %1746 = vmatmul.msk.bf16.vlgmr.msrb.gmra.mxu2 %vm175_vm1, %v1452_v39 }
0x130c   :  { %v1477_v40 = vpop.f32.mrf.mxu2 }
0x130d   :  { %v1481_v41 = vmul.f32 %v1477_v40, %v1477_v40 }
0x130f   :  { %v1483_v43 = vsel %vm1482_vm13, %v1481_v41, 0.0 }
0x1310   :  { %1484 = vadd.xlane.f32.xlu0 %v1483_v43 }
0x1314   :  { %v1479_v45 = vpop.f32.mrf.mxu2 }
0x1383   :  { %v1485_v47 = vpop.xlane.xlu0 %1484 }
0x1384   :  { %v1486_v48 = vmax.f32 %v1485_v47, 1e-24 }
0x1386   :  { %1900 = vrsqrt.f32 %v1486_v48  ;;  %vm1493_vm0 = vweird.f32 %v1486_v48 }
0x138c   :  { %v1901_v4 = vpop.eup %1900 }
0x138d   :  { %v1488_v20 = vmul.f32 %v1901_v4, %v1486_v48  ;;  %vm1494_vm14 = vweird.f32 %v1901_v4 }
0x138e   :  { %vm1495_vm1 = vmor %vm1493_vm0, %vm1494_vm14 }
0x138f   :  { %v1489_v50 = vmul.f32 %v1901_v4, %v1488_v20 }
0x1391   :  { %v1490_v12 = vmul.f32 0.5, %v1489_v50 }
0x1393   :  { %v1491_v51 = vsub.f32 1.5, %v1490_v12 }
0x1395   :  { %v1492_v52 = vmul.f32 %v1901_v4, %v1491_v51 }
0x1397   :  { %v1496_v53 = vsel %vm1495_vm1, %v1901_v4, %v1492_v52 }
0x1398   :  { %v1497_v10 = vmul.f32 %v1496_v53, %v1477_v40 }
0x139a   :  { %1498 = vst.msk [vmem:[#allocation2] sm:$0x3] %vm1482_vm13, %v1497_v10 }
0x139b   :  { %1509 = dma.vmem_to_hbm [thread:$0]  %s1505_s19, 32, %s1507_s22, [#allocation3]  }
0x139c   :  { %1926 = dma.done.wait [#allocation3], 32  }
0x139d   :  { %1927 = vsyncadd [#allocation3], 4294967264 }
0x139e   :  { %1514 = vsyncpa [#allocation3], 1 }

</bundles_post_ra>
